<compile_context>
chip_gen: v7x
topology: tpu7x:2x2x1
jax: 0.10.0
libtpu: 0.0.40
codegen_flags: <defaults>
</compile_context>

<pallas_src>
import math
import functools

import numpy as np
import jax
import jax.numpy as jnp
from jax.experimental import pallas as pl
from jax.experimental.pallas import tpu as pltpu


# ----------------------------------------------------------------------------
# Fused kernel: K/V/Q projections + multi-head attention + output projection +
#               ReLU + LayerNorm + link/edge scoring head.
# One grid step = one block of edges (its src row group + all dst row groups).
# ----------------------------------------------------------------------------
def _adapt_sampler_kernel(num_head, att_clamp, mxu_dtype,
                          # inputs
                          h_root_ref,   # (G, tE, Dn)        G = 2 + num_neg
                          link_ref,     # (G, tE, N, Dl)     Dl = Dn+De+Dt
                          w_kv_ref,     # (Dl, 2*Do)         [K | V] fused
                          w_root_ref,   # (Dn, 2*Do)         [wq_n*scale | wo_n]
                          wo_a_ref,     # (Do, Do)
                          w_sd_ref,     # (Do, 2*Do)         [src_w | dst_w]
                          misc_ref,     # (8, 128) packed biases / LN / out head
                          # output
                          score_ref):   # (G-1, tE)
    def dot(a, b):
        # bf16 operands on the MXU (default) ~2-4x throughput on v5e/v6e/v7x;
        # accumulation stays f32; all non-MXU math below stays f32 (v5e has no
        # bf16 VPU/EUP).
        return jnp.dot(a.astype(mxu_dtype), b.astype(mxu_dtype),
                       preferred_element_type=jnp.float32)

    G, tE, Dn = h_root_ref.shape
    N = link_ref.shape[2]
    Dl = link_ref.shape[3]
    two_do = w_kv_ref.shape[1]
    Do = two_do // 2
    dh = Do // num_head
    B = G * tE

    # ---- unpack the packed small parameters (static, lane-0-based slices) ----
    misc = misc_ref[...]
    b_kv = misc[0:1, :two_do]          # [bk | bv]
    b_root = misc[1:2, :two_do]        # [bq_eff*scale | bo]
    ln_g = misc[2:3, :Do]
    ln_b = misc[3:4, :Do]
    b_sd = misc[4:5, :two_do]          # [src_b | dst_b]
    out_w = misc[5:6, :Do]             # final (Do -> 1) projection, as a row
    out_b = misc[6:7, 0:1]

    h_root = h_root_ref[...].reshape(B, Dn)
    link = link_ref[...].reshape(B * N, Dl)

    # ---- fused K||V projection: ONE wide matmul (Dl-deep, 2*Do lanes) ----
    kv = dot(link, w_kv_ref[...]) + b_kv                       # (B*N, 2*Do)
    K3 = kv[:, :Do].reshape(B, N, Do)                          # sliced exactly once
    V3 = kv[:, Do:].reshape(B, N, Do)

    # ---- fused Q / output-node projection on h_root (one 2*Do-lane matmul) ----
    root_proj = dot(h_root, w_root_ref[...]) + b_root          # (B, 2*Do)
    Q = root_proj[:, :Do]              # 1/sqrt(dh) already folded into weights
    acc = root_proj[:, Do:]            # h_root @ wo_n + bo

    # ---- multi-head attention (q=1): VPU broadcast-mul + reduces, heads
    #      statically unrolled; MXU would be <1%-full pushes at this shape ----
    heads = []
    for h in range(num_head):
        sl = slice(h * dh, (h + 1) * dh)
        qh = Q[:, sl]                                          # (B, dh)
        kh = K3[:, :, sl]                                      # (B, N, dh)
        vh = V3[:, :, sl]                                      # (B, N, dh)
        s = jnp.sum(qh[:, None, :] * kh, axis=-1)              # (B, N)  lane reduce
        s = jnp.clip(s, -att_clamp, att_clamp)
        # scores clipped to +-att_clamp (checked <80 host-side) -> exp is safe
        # without max-subtraction.
        p = jnp.exp(s)
        p = p * pl.reciprocal(jnp.sum(p, axis=-1, keepdims=True), approx=True)
        heads.append(jnp.sum(p[:, :, None] * vh, axis=1))      # (B, dh) sublane reduce
    att = jnp.concatenate(heads, axis=-1)                      # (B, Do)
    acc = acc + dot(att, wo_a_ref[...])                        # single hoisted out-proj

    # ---- ReLU + LayerNorm (eps=1e-5), single-pass variance ----
    rst = jnp.maximum(acc, 0.0)
    mu = jnp.mean(rst, axis=-1, keepdims=True)
    msq = jnp.mean(rst * rst, axis=-1, keepdims=True)
    var = msq - mu * mu
    h_out = (rst - mu) * jax.lax.rsqrt(var + 1e-5) * ln_g + ln_b     # (B, Do)

    # ---- link/edge scoring head: one fused [src|dst] matmul over ALL rows ----
    sd = dot(h_out, w_sd_ref[...]) + b_sd                      # (B, 2*Do)
    sd3 = sd.reshape(G, tE, two_do)
    h_src = sd3[0, :, :Do]                                     # (tE, Do)
    h_dst = sd3[1:, :, Do:]                                    # (G-1, tE, Do)
    e_all = jnp.maximum(h_src[None, :, :] + h_dst, 0.0)        # (G-1, tE, Do)
    # (Do -> 1) projection as multiply + lane reduce -> lane-dense score rows
    s_all = jnp.sum(e_all * out_w[None, :, :], axis=-1) + out_b
    score_ref[...] = s_all                                     # (G-1, tE)


# ----------------------------------------------------------------------------
# Host wrapper: parameter fusion (pure functions of params, cached across steps
# in prod), group-major layout plumbing, and the gridded pallas_call.
# ----------------------------------------------------------------------------
def adapt_sampler_forward(block, agg_params, ep_params, num_head, att_clamp,
                          num_neg, mxu_dtype=jnp.bfloat16, edge_block=None):
    # exp() without max-subtraction is only safe while exp(att_clamp) fits f32.
    assert float(att_clamp) < 80.0, "att_clamp too large for unshifted exp in f32"

    h_root, h_neigh = block["h_root"], block["h_neigh"]
    e_feat, dt = block["e_feat"], block["dt"]
    ap, epp = agg_params, ep_params

    B, Dn = h_root.shape
    N = h_neigh.shape[0] // B
    Do = ap["wq_n"].shape[1]
    G = num_neg + 2
    assert B % G == 0
    E = B // G
    dh = Do // num_head
    scale = 1.0 / math.sqrt(dh)

    # ---- fixed time encoding folded host-side; one lane-dense link operand ----
    t_enc = jnp.cos(dt * ap["time_w"] + ap["time_b"])                  # (B*N, Dt)
    link_feat = jnp.concatenate([h_neigh, e_feat, t_enc], axis=1)      # (B*N, Dl)
    Dl = link_feat.shape[1]

    # ---- host-side weight fusion ----
    w_kv = jnp.concatenate(
        [jnp.concatenate([ap["wk_n"], ap["wk_e"], ap["wk_t"]], axis=0),
         jnp.concatenate([ap["wv_n"], ap["wv_e"], ap["wv_t"]], axis=0)],
        axis=1)                                                        # (Dl, 2*Do)
    b_kv = jnp.concatenate([ap["bk"], ap["bv"]], axis=1)               # (1, 2*Do)
    bq_eff = jnp.cos(ap["time_b"]) @ ap["wq_t"] + ap["bq"]             # zero-time Q term
    w_root = jnp.concatenate([ap["wq_n"] * scale, ap["wo_n"]], axis=1) # (Dn, 2*Do)
    b_root = jnp.concatenate([bq_eff * scale, ap["bo"]], axis=1)       # (1, 2*Do)
    w_sd = jnp.concatenate([epp["src_w"], epp["dst_w"]], axis=1)       # (Do, 2*Do)
    b_sd = jnp.concatenate([epp["src_b"], epp["dst_b"]], axis=1)       # (1, 2*Do)

    # ---- pack all small row-vector params into ONE (8,128) operand ----
    misc = jnp.zeros((8, 128), jnp.float32)
    misc = misc.at[0, :2 * Do].set(b_kv[0])
    misc = misc.at[1, :2 * Do].set(b_root[0])
    misc = misc.at[2, :Do].set(ap["ln_g"][0])
    misc = misc.at[3, :Do].set(ap["ln_b"][0])
    misc = misc.at[4, :2 * Do].set(b_sd[0])
    misc = misc.at[5, :Do].set(epp["out_w"][:, 0])
    misc = misc.at[6, 0].set(epp["out_b"][0, 0])

    # ---- group-major layout: one edge block holds its src row + all dst rows ----
    h_root_g = h_root.reshape(G, E, Dn)
    link_g = link_feat.reshape(G, E, N, Dl)

    if edge_block is None:
        if E % 128 == 0:
            edge_block = 128
            for cand in (512, 384, 256):                 # largest tile that divides E
                if E % cand == 0:
                    edge_block = cand
                    break
        else:
            edge_block = E   # toy sizes: single block (masked store; pad E to a
                             # multiple of 128 host-side at production sizes)
    assert E % edge_block == 0
    n_blk = E // edge_block

    kernel = functools.partial(_adapt_sampler_kernel, num_head,
                               float(att_clamp), mxu_dtype)
    const2 = lambda i: (0, 0)   # resident weights: fetched once, stay in VMEM
    grid_spec = pltpu.PrefetchScalarGridSpec(
        num_scalar_prefetch=0,
        grid=(n_blk,),
        in_specs=[
            pl.BlockSpec((G, edge_block, Dn), lambda i: (0, i, 0)),
            pl.BlockSpec((G, edge_block, N, Dl), lambda i: (0, i, 0, 0)),
            pl.BlockSpec(w_kv.shape, const2),
            pl.BlockSpec(w_root.shape, const2),
            pl.BlockSpec(ap["wo_a"].shape, const2),
            pl.BlockSpec(w_sd.shape, const2),
            pl.BlockSpec(misc.shape, const2),
        ],
        out_specs=pl.BlockSpec((G - 1, edge_block), lambda i: (0, i)),
    )
    scores = pl.pallas_call(
        kernel,
        out_shape=jax.ShapeDtypeStruct((G - 1, E), jnp.float32),
        grid_spec=grid_spec,
        compiler_params=pltpu.CompilerParams(
            dimension_semantics=("parallel",),            # megacore / 2 TCs on v7x
            vmem_limit_bytes=48 * 1024 * 1024,            # headroom vs v7x 64 MiB phys
        ),
    )(h_root_g, link_g, w_kv, w_root, ap["wo_a"], w_sd, misc)

    pos = scores[0].reshape(E, 1)
    neg = scores[1:].reshape(num_neg * E, 1)
    return pos, neg


# ----------------------------------------------------------------------------
# Pure-JAX reference (same math, unfused params) for the correctness check.
# ----------------------------------------------------------------------------
def _reference(block, ap, ep, num_head, att_clamp, num_neg):
    h_root, h_neigh = block["h_root"], block["h_neigh"]
    e_feat, dt = block["e_feat"], block["dt"]
    B = h_root.shape[0]
    N = h_neigh.shape[0] // B
    Do = ap["wq_n"].shape[1]
    dh = Do // num_head

    t_enc = jnp.cos(dt * ap["time_w"] + ap["time_b"])
    zero_t = jnp.cos(ap["time_b"])
    Q = h_root @ ap["wq_n"] + zero_t @ ap["wq_t"] + ap["bq"]
    K = h_neigh @ ap["wk_n"] + e_feat @ ap["wk_e"] + t_enc @ ap["wk_t"] + ap["bk"]
    V = h_neigh @ ap["wv_n"] + e_feat @ ap["wv_e"] + t_enc @ ap["wv_t"] + ap["bv"]
    K3 = K.reshape(B, N, Do)
    V3 = V.reshape(B, N, Do)
    acc = h_root @ ap["wo_n"] + ap["bo"]
    for h in range(num_head):
        qh = Q[:, h * dh:(h + 1) * dh]
        kh = K3[:, :, h * dh:(h + 1) * dh]
        vh = V3[:, :, h * dh:(h + 1) * dh]
        s = jnp.sum(qh[:, None, :] * kh, -1) / math.sqrt(dh)
        s = jnp.clip(s, -att_clamp, att_clamp)
        p = jax.nn.softmax(s, axis=1)
        ah = jnp.sum(p[:, :, None] * vh, 1)
        acc = acc + ah @ ap["wo_a"][h * dh:(h + 1) * dh, :]
    rst = jax.nn.relu(acc)
    mu = rst.mean(-1, keepdims=True)
    var = ((rst - mu) ** 2).mean(-1, keepdims=True)
    h_out = (rst - mu) * jax.lax.rsqrt(var + 1e-5) * ap["ln_g"] + ap["ln_b"]

    E = B // (num_neg + 2)
    h_src = h_out[:E] @ ep["src_w"] + ep["src_b"]
    h_pos = h_out[E:2 * E] @ ep["dst_w"] + ep["dst_b"]
    h_neg = h_out[2 * E:] @ ep["dst_w"] + ep["dst_b"]
    pos = jax.nn.relu(h_src + h_pos) @ ep["out_w"] + ep["out_b"]
    src_rep = jnp.tile(h_src, (num_neg, 1))
    neg = jax.nn.relu(src_rep + h_neg) @ ep["out_w"] + ep["out_b"]
    return pos, neg


# ----------------------------------------------------------------------------
def _init_params(key, Dn, De, Dt, Do):
    ks = jax.random.split(key, 16)
    f = jnp.float32
    lin = lambda k, i, o: (jax.random.normal(k, (i, o), f) / math.sqrt(i))
    # fixed (TGAT-style) time encoder
    time_w = (1.0 / (10.0 ** jnp.linspace(0.0, 9.0, Dt))).reshape(1, Dt).astype(f)
    time_b = jnp.zeros((1, Dt), f)
    agg = dict(
        time_w=time_w, time_b=time_b,
        wq_n=lin(ks[0], Dn, Do), wq_t=lin(ks[1], Dt, Do),
        bq=jnp.zeros((1, Do), f),
        wk_n=lin(ks[2], Dn, Do), wk_e=lin(ks[3], De, Do),
        wk_t=lin(ks[4], Dt, Do), bk=jnp.zeros((1, Do), f),
        wv_n=lin(ks[5], Dn, Do), wv_e=lin(ks[6], De, Do),
        wv_t=lin(ks[7], Dt, Do), bv=jnp.zeros((1, Do), f),
        wo_n=lin(ks[8], Dn, Do), wo_a=lin(ks[9], Do, Do),
        bo=jnp.zeros((1, Do), f),
        ln_g=jnp.ones((1, Do), f), ln_b=jnp.zeros((1, Do), f),
    )
    ep = dict(
        src_w=lin(ks[10], Do, Do), src_b=jnp.zeros((1, Do), f),
        dst_w=lin(ks[11], Do, Do), dst_b=jnp.zeros((1, Do), f),
        out_w=lin(ks[12], Do, 1), out_b=jnp.zeros((1, 1), f),
    )
    return agg, ep


if __name__ == "__main__":
    # config-equivalent hyperparameters (small, deterministic)
    Dn, De, Dt, Do = 32, 16, 16, 32          # node / edge / time / out dims
    num_head, num_neigh, att_clamp = 2, 8, 10.0
    num_edge, num_neg = 8, 1                 # -> (2 + neg) * num_edge dst nodes
    B = (num_neg + 2) * num_edge             # 24 destination nodes

    key = jax.random.PRNGKey(0)
    k_in, k_par = jax.random.split(key)
    k1, k2, k3, k4 = jax.random.split(k_in, 4)

    block = dict(
        h_root=jax.random.normal(k1, (B, Dn), jnp.float32),
        h_neigh=jax.random.normal(k2, (B * num_neigh, Dn), jnp.float32),
        e_feat=jax.random.normal(k3, (B * num_neigh, De), jnp.float32),
        dt=jax.random.uniform(k4, (B * num_neigh, 1), jnp.float32,
                              minval=0.0, maxval=100.0),
    )
    agg_params, ep_params = _init_params(k_par, Dn, De, Dt, Do)

    pos_ref, neg_ref = _reference(block, agg_params, ep_params,
                                  num_head, att_clamp, num_neg)

    # strict check: f32 MXU operands (only approx-reciprocal differs from ref)
    pos32, neg32 = adapt_sampler_forward(block, agg_params, ep_params,
                                         num_head, att_clamp, num_neg,
                                         mxu_dtype=jnp.float32)
    jax.block_until_ready((pos32, neg32))
    np.testing.assert_allclose(np.asarray(pos32), np.asarray(pos_ref),
                               rtol=5e-3, atol=5e-3)
    np.testing.assert_allclose(np.asarray(neg32), np.asarray(neg_ref),
                               rtol=5e-3, atol=5e-3)

    # production path: bf16 MXU operands (f32 accumulate) - loose sanity check
    pos16, neg16 = adapt_sampler_forward(block, agg_params, ep_params,
                                         num_head, att_clamp, num_neg,
                                         mxu_dtype=jnp.bfloat16)
    jax.block_until_ready((pos16, neg16))
    np.testing.assert_allclose(np.asarray(pos16), np.asarray(pos_ref),
                               rtol=2e-1, atol=2e-1)
    np.testing.assert_allclose(np.asarray(neg16), np.asarray(neg_ref),
                               rtol=2e-1, atol=2e-1)

    print("KERNEL_OK")
</pallas_src>

<mosaic_0001>
module attributes {stable_mosaic.version = 11 : i64} {
  func.func @_adapt_sampler_kernel(%arg0: i32, %arg1: memref<3x8x32xf32, #tpu.memory_space<vmem>>, %arg2: memref<3x8x8x64xf32, #tpu.memory_space<vmem>>, %arg3: memref<64x64xf32, #tpu.memory_space<vmem>>, %arg4: memref<32x64xf32, #tpu.memory_space<vmem>>, %arg5: memref<32x32xf32, #tpu.memory_space<vmem>>, %arg6: memref<32x64xf32, #tpu.memory_space<vmem>>, %arg7: memref<8x128xf32, #tpu.memory_space<vmem>>, %arg8: memref<2x8xf32, #tpu.memory_space<vmem>>) attributes {dimension_semantics = [#tpu.dimension_semantics<parallel>], iteration_bounds = array<i64: 1>, scalar_prefetch = 0 : i64, scratch_operands = 0 : i64, tpu.core_type = #tpu.core_type<tc>, window_params = [{transform_indices = @transform_0, window_bounds = array<i64: 3, 8, 32>}, {transform_indices = @transform_1, window_bounds = array<i64: 3, 8, 8, 64>}, {pipeline_mode = #tpu.pipeline_mode<synchronous>, transform_indices = @transform_2, window_bounds = array<i64: 64, 64>}, {pipeline_mode = #tpu.pipeline_mode<synchronous>, transform_indices = @transform_3, window_bounds = array<i64: 32, 64>}, {pipeline_mode = #tpu.pipeline_mode<synchronous>, transform_indices = @transform_4, window_bounds = array<i64: 32, 32>}, {pipeline_mode = #tpu.pipeline_mode<synchronous>, transform_indices = @transform_5, window_bounds = array<i64: 32, 64>}, {pipeline_mode = #tpu.pipeline_mode<synchronous>, transform_indices = @transform_6, window_bounds = array<i64: 8, 128>}, {transform_indices = @transform_7, window_bounds = array<i64: 2, 8>}]} {
    %c0 = arith.constant 0 : index
    %c0_0 = arith.constant 0 : index
    %0 = vector.load %arg7[%c0, %c0_0] : memref<8x128xf32, #tpu.memory_space<vmem>>, vector<8x128xf32>
    %1 = vector.extract_strided_slice %0 {offsets = [0, 0], sizes = [1, 64], strides = [1, 1]} : vector<8x128xf32> to vector<1x64xf32>
    %2 = vector.extract_strided_slice %0 {offsets = [1, 0], sizes = [1, 64], strides = [1, 1]} : vector<8x128xf32> to vector<1x64xf32>
    %3 = vector.extract_strided_slice %0 {offsets = [2, 0], sizes = [1, 32], strides = [1, 1]} : vector<8x128xf32> to vector<1x32xf32>
    %4 = vector.extract_strided_slice %0 {offsets = [3, 0], sizes = [1, 32], strides = [1, 1]} : vector<8x128xf32> to vector<1x32xf32>
    %5 = vector.extract_strided_slice %0 {offsets = [4, 0], sizes = [1, 64], strides = [1, 1]} : vector<8x128xf32> to vector<1x64xf32>
    %6 = vector.extract_strided_slice %0 {offsets = [5, 0], sizes = [1, 32], strides = [1, 1]} : vector<8x128xf32> to vector<1x32xf32>
    %7 = vector.extract_strided_slice %0 {offsets = [6, 0], sizes = [1, 1], strides = [1, 1]} : vector<8x128xf32> to vector<1x1xf32>
    %c0_1 = arith.constant 0 : index
    %c0_2 = arith.constant 0 : index
    %c0_3 = arith.constant 0 : index
    %8 = vector.load %arg1[%c0_1, %c0_2, %c0_3] : memref<3x8x32xf32, #tpu.memory_space<vmem>>, vector<3x8x32xf32>
    %9 = vector.shape_cast %8 : vector<3x8x32xf32> to vector<24x32xf32>
    %c0_4 = arith.constant 0 : index
    %c0_5 = arith.constant 0 : index
    %c0_6 = arith.constant 0 : index
    %c0_7 = arith.constant 0 : index
    %10 = vector.load %arg2[%c0_4, %c0_5, %c0_6, %c0_7] : memref<3x8x8x64xf32, #tpu.memory_space<vmem>>, vector<3x8x8x64xf32>
    %11 = vector.shape_cast %10 : vector<3x8x8x64xf32> to vector<192x64xf32>
    %c0_8 = arith.constant 0 : index
    %c0_9 = arith.constant 0 : index
    %12 = vector.load %arg3[%c0_8, %c0_9] : memref<64x64xf32, #tpu.memory_space<vmem>>, vector<64x64xf32>
    %cst = arith.constant dense<0.000000e+00> : vector<192x64xf32>
    %13 = tpu.matmul %11, %12, %cst {dimension_numbers = #tpu.dot_dimension_numbers<[1], [0], [0], [1], [0, 0, 1, 1], [], []>} : vector<192x64xf32>, vector<64x64xf32>, vector<192x64xf32> -> vector<192x64xf32>
    %14 = vector.broadcast %1 : vector<1x64xf32> to vector<192x64xf32>
    %15 = arith.addf %13, %14 : vector<192x64xf32>
    %16 = vector.extract_strided_slice %15 {offsets = [0, 0], sizes = [192, 32], strides = [1, 1]} : vector<192x64xf32> to vector<192x32xf32>
    %17 = vector.shape_cast %16 : vector<192x32xf32> to vector<24x8x32xf32>
    %18 = vector.extract_strided_slice %15 {offsets = [0, 32], sizes = [192, 32], strides = [1, 1]} : vector<192x64xf32> to vector<192x32xf32>
    %19 = vector.shape_cast %18 : vector<192x32xf32> to vector<24x8x32xf32>
    %c0_10 = arith.constant 0 : index
    %c0_11 = arith.constant 0 : index
    %20 = vector.load %arg4[%c0_10, %c0_11] : memref<32x64xf32, #tpu.memory_space<vmem>>, vector<32x64xf32>
    %cst_12 = arith.constant dense<0.000000e+00> : vector<24x64xf32>
    %21 = tpu.matmul %9, %20, %cst_12 {dimension_numbers = #tpu.dot_dimension_numbers<[1], [0], [0], [1], [0, 0, 1, 1], [], []>} : vector<24x32xf32>, vector<32x64xf32>, vector<24x64xf32> -> vector<24x64xf32>
    %22 = vector.broadcast %2 : vector<1x64xf32> to vector<24x64xf32>
    %23 = arith.addf %21, %22 : vector<24x64xf32>
    %24 = vector.extract_strided_slice %23 {offsets = [0, 0], sizes = [24, 32], strides = [1, 1]} : vector<24x64xf32> to vector<24x32xf32>
    %25 = vector.extract_strided_slice %23 {offsets = [0, 32], sizes = [24, 32], strides = [1, 1]} : vector<24x64xf32> to vector<24x32xf32>
    %26 = vector.extract_strided_slice %24 {offsets = [0, 0], sizes = [24, 16], strides = [1, 1]} : vector<24x32xf32> to vector<24x16xf32>
    %27 = vector.extract_strided_slice %17 {offsets = [0, 0, 0], sizes = [24, 8, 16], strides = [1, 1, 1]} : vector<24x8x32xf32> to vector<24x8x16xf32>
    %28 = vector.extract_strided_slice %19 {offsets = [0, 0, 0], sizes = [24, 8, 16], strides = [1, 1, 1]} : vector<24x8x32xf32> to vector<24x8x16xf32>
    %29 = vector.shape_cast %26 : vector<24x16xf32> to vector<24x1x16xf32>
    %30 = vector.broadcast %29 : vector<24x1x16xf32> to vector<24x8x16xf32>
    %31 = arith.mulf %30, %27 : vector<24x8x16xf32>
    %cst_13 = arith.constant dense<0.000000e+00> : vector<24x8xf32>
    %32 = vector.multi_reduction <add>, %31, %cst_13 [2] : vector<24x8x16xf32> to vector<24x8xf32>
    %cst_14 = arith.constant -1.000000e+01 : f32
    %cst_15 = arith.constant 1.000000e+01 : f32
    %33 = vector.broadcast %cst_14 : f32 to vector<24x8xf32>
    %34 = arith.maximumf %33, %32 : vector<24x8xf32>
    %35 = vector.broadcast %cst_15 : f32 to vector<24x8xf32>
    %36 = arith.minimumf %35, %34 : vector<24x8xf32>
    %37 = math.exp %36 : vector<24x8xf32>
    %cst_16 = arith.constant dense<0.000000e+00> : vector<24xf32>
    %38 = vector.multi_reduction <add>, %37, %cst_16 [1] : vector<24x8xf32> to vector<24xf32>
    %39 = vector.shape_cast %38 : vector<24xf32> to vector<24x1xf32>
    %40 = tpu.reciprocal %39 {approx = true} : vector<24x1xf32> -> vector<24x1xf32>
    %41 = vector.broadcast %40 : vector<24x1xf32> to vector<24x8xf32>
    %42 = arith.mulf %37, %41 : vector<24x8xf32>
    %43 = vector.shape_cast %42 : vector<24x8xf32> to vector<24x8x1xf32>
    %44 = vector.broadcast %43 : vector<24x8x1xf32> to vector<24x8x16xf32>
    %45 = arith.mulf %44, %28 : vector<24x8x16xf32>
    %cst_17 = arith.constant dense<0.000000e+00> : vector<24x16xf32>
    %46 = vector.multi_reduction <add>, %45, %cst_17 [1] : vector<24x8x16xf32> to vector<24x16xf32>
    %47 = vector.extract_strided_slice %24 {offsets = [0, 16], sizes = [24, 16], strides = [1, 1]} : vector<24x32xf32> to vector<24x16xf32>
    %48 = vector.extract_strided_slice %17 {offsets = [0, 0, 16], sizes = [24, 8, 16], strides = [1, 1, 1]} : vector<24x8x32xf32> to vector<24x8x16xf32>
    %49 = vector.extract_strided_slice %19 {offsets = [0, 0, 16], sizes = [24, 8, 16], strides = [1, 1, 1]} : vector<24x8x32xf32> to vector<24x8x16xf32>
    %50 = vector.shape_cast %47 : vector<24x16xf32> to vector<24x1x16xf32>
    %51 = vector.broadcast %50 : vector<24x1x16xf32> to vector<24x8x16xf32>
    %52 = arith.mulf %51, %48 : vector<24x8x16xf32>
    %cst_18 = arith.constant dense<0.000000e+00> : vector<24x8xf32>
    %53 = vector.multi_reduction <add>, %52, %cst_18 [2] : vector<24x8x16xf32> to vector<24x8xf32>
    %cst_19 = arith.constant -1.000000e+01 : f32
    %cst_20 = arith.constant 1.000000e+01 : f32
    %54 = vector.broadcast %cst_19 : f32 to vector<24x8xf32>
    %55 = arith.maximumf %54, %53 : vector<24x8xf32>
    %56 = vector.broadcast %cst_20 : f32 to vector<24x8xf32>
    %57 = arith.minimumf %56, %55 : vector<24x8xf32>
    %58 = math.exp %57 : vector<24x8xf32>
    %cst_21 = arith.constant dense<0.000000e+00> : vector<24xf32>
    %59 = vector.multi_reduction <add>, %58, %cst_21 [1] : vector<24x8xf32> to vector<24xf32>
    %60 = vector.shape_cast %59 : vector<24xf32> to vector<24x1xf32>
    %61 = tpu.reciprocal %60 {approx = true} : vector<24x1xf32> -> vector<24x1xf32>
    %62 = vector.broadcast %61 : vector<24x1xf32> to vector<24x8xf32>
    %63 = arith.mulf %58, %62 : vector<24x8xf32>
    %64 = vector.shape_cast %63 : vector<24x8xf32> to vector<24x8x1xf32>
    %65 = vector.broadcast %64 : vector<24x8x1xf32> to vector<24x8x16xf32>
    %66 = arith.mulf %65, %49 : vector<24x8x16xf32>
    %cst_22 = arith.constant dense<0.000000e+00> : vector<24x16xf32>
    %67 = vector.multi_reduction <add>, %66, %cst_22 [1] : vector<24x8x16xf32> to vector<24x16xf32>
    %68 = tpu.concatenate %46, %67 in 1 : vector<24x16xf32>, vector<24x16xf32> -> vector<24x32xf32>
    %c0_23 = arith.constant 0 : index
    %c0_24 = arith.constant 0 : index
    %69 = vector.load %arg5[%c0_23, %c0_24] : memref<32x32xf32, #tpu.memory_space<vmem>>, vector<32x32xf32>
    %cst_25 = arith.constant dense<0.000000e+00> : vector<24x32xf32>
    %70 = tpu.matmul %68, %69, %cst_25 {dimension_numbers = #tpu.dot_dimension_numbers<[1], [0], [0], [1], [0, 0, 1, 1], [], []>} : vector<24x32xf32>, vector<32x32xf32>, vector<24x32xf32> -> vector<24x32xf32>
    %71 = arith.addf %25, %70 : vector<24x32xf32>
    %cst_26 = arith.constant 0.000000e+00 : f32
    %72 = vector.broadcast %cst_26 : f32 to vector<24x32xf32>
    %73 = arith.maximumf %71, %72 : vector<24x32xf32>
    %cst_27 = arith.constant dense<0.000000e+00> : vector<24xf32>
    %74 = vector.multi_reduction <add>, %73, %cst_27 [1] : vector<24x32xf32> to vector<24xf32>
    %75 = vector.shape_cast %74 : vector<24xf32> to vector<24x1xf32>
    %cst_28 = arith.constant 3.200000e+01 : f32
    %76 = vector.broadcast %cst_28 : f32 to vector<24x1xf32>
    %77 = arith.divf %75, %76 : vector<24x1xf32>
    %78 = arith.mulf %73, %73 : vector<24x32xf32>
    %cst_29 = arith.constant dense<0.000000e+00> : vector<24xf32>
    %79 = vector.multi_reduction <add>, %78, %cst_29 [1] : vector<24x32xf32> to vector<24xf32>
    %80 = vector.shape_cast %79 : vector<24xf32> to vector<24x1xf32>
    %cst_30 = arith.constant 3.200000e+01 : f32
    %81 = vector.broadcast %cst_30 : f32 to vector<24x1xf32>
    %82 = arith.divf %80, %81 : vector<24x1xf32>
    %83 = arith.mulf %77, %77 : vector<24x1xf32>
    %84 = arith.subf %82, %83 : vector<24x1xf32>
    %85 = vector.broadcast %77 : vector<24x1xf32> to vector<24x32xf32>
    %86 = arith.subf %73, %85 : vector<24x32xf32>
    %cst_31 = arith.constant 9.99999974E-6 : f32
    %87 = vector.broadcast %cst_31 : f32 to vector<24x1xf32>
    %88 = arith.addf %84, %87 : vector<24x1xf32>
    %89 = math.rsqrt %88 : vector<24x1xf32>
    %90 = vector.broadcast %89 : vector<24x1xf32> to vector<24x32xf32>
    %91 = arith.mulf %86, %90 : vector<24x32xf32>
    %92 = vector.broadcast %3 : vector<1x32xf32> to vector<24x32xf32>
    %93 = arith.mulf %91, %92 : vector<24x32xf32>
    %94 = vector.broadcast %4 : vector<1x32xf32> to vector<24x32xf32>
    %95 = arith.addf %93, %94 : vector<24x32xf32>
    %c0_32 = arith.constant 0 : index
    %c0_33 = arith.constant 0 : index
    %96 = vector.load %arg6[%c0_32, %c0_33] : memref<32x64xf32, #tpu.memory_space<vmem>>, vector<32x64xf32>
    %cst_34 = arith.constant dense<0.000000e+00> : vector<24x64xf32>
    %97 = tpu.matmul %95, %96, %cst_34 {dimension_numbers = #tpu.dot_dimension_numbers<[1], [0], [0], [1], [0, 0, 1, 1], [], []>} : vector<24x32xf32>, vector<32x64xf32>, vector<24x64xf32> -> vector<24x64xf32>
    %98 = vector.broadcast %5 : vector<1x64xf32> to vector<24x64xf32>
    %99 = arith.addf %97, %98 : vector<24x64xf32>
    %100 = vector.shape_cast %99 : vector<24x64xf32> to vector<3x8x64xf32>
    %101 = vector.extract_strided_slice %100 {offsets = [0, 0, 0], sizes = [1, 8, 32], strides = [1, 1, 1]} : vector<3x8x64xf32> to vector<1x8x32xf32>
    %102 = vector.shape_cast %101 : vector<1x8x32xf32> to vector<8x32xf32>
    %103 = vector.extract_strided_slice %100 {offsets = [1, 0, 32], sizes = [2, 8, 32], strides = [1, 1, 1]} : vector<3x8x64xf32> to vector<2x8x32xf32>
    %104 = vector.shape_cast %102 : vector<8x32xf32> to vector<1x8x32xf32>
    %105 = vector.broadcast %104 : vector<1x8x32xf32> to vector<2x8x32xf32>
    %106 = arith.addf %105, %103 : vector<2x8x32xf32>
    %cst_35 = arith.constant 0.000000e+00 : f32
    %107 = vector.broadcast %cst_35 : f32 to vector<2x8x32xf32>
    %108 = arith.maximumf %106, %107 : vector<2x8x32xf32>
    %109 = vector.shape_cast %6 : vector<1x32xf32> to vector<1x1x32xf32>
    %110 = vector.broadcast %109 : vector<1x1x32xf32> to vector<2x8x32xf32>
    %111 = arith.mulf %108, %110 : vector<2x8x32xf32>
    %cst_36 = arith.constant dense<0.000000e+00> : vector<2x8xf32>
    %112 = vector.multi_reduction <add>, %111, %cst_36 [2] : vector<2x8x32xf32> to vector<2x8xf32>
    %113 = vector.broadcast %7 : vector<1x1xf32> to vector<2x8xf32>
    %114 = arith.addf %112, %113 : vector<2x8xf32>
    %c0_37 = arith.constant 0 : index
    %c0_38 = arith.constant 0 : index
    %115 = vector.load %arg8[%c0_37, %c0_38] : memref<2x8xf32, #tpu.memory_space<vmem>>, vector<2x8xf32>
    tpu.vector_store %arg8[%c0_37, %c0_38], %114 {strides = array<i32>} : memref<2x8xf32, #tpu.memory_space<vmem>>, vector<2x8xf32>,
    return
  }
  func.func @transform_0(%arg0: i32) -> (i32, i32, i32) {
    %c0_i32 = arith.constant 0 : i32
    %c0_i32_0 = arith.constant 0 : i32
    %c0_i32_1 = arith.constant 0 : i32
    return %c0_i32, %arg0, %c0_i32_0 : i32, i32, i32
  }
  func.func @transform_1(%arg0: i32) -> (i32, i32, i32, i32) {
    %c0_i32 = arith.constant 0 : i32
    %c0_i32_0 = arith.constant 0 : i32
    %c0_i32_1 = arith.constant 0 : i32
    %c0_i32_2 = arith.constant 0 : i32
    return %c0_i32, %arg0, %c0_i32_0, %c0_i32_1 : i32, i32, i32, i32
  }
  func.func @transform_2(%arg0: i32) -> (i32, i32) {
    %c0_i32 = arith.constant 0 : i32
    %c0_i32_0 = arith.constant 0 : i32
    %c0_i32_1 = arith.constant 0 : i32
    return %c0_i32, %c0_i32_0 : i32, i32
  }
  func.func @transform_3(%arg0: i32) -> (i32, i32) {
    %c0_i32 = arith.constant 0 : i32
    %c0_i32_0 = arith.constant 0 : i32
    %c0_i32_1 = arith.constant 0 : i32
    return %c0_i32, %c0_i32_0 : i32, i32
  }
  func.func @transform_4(%arg0: i32) -> (i32, i32) {
    %c0_i32 = arith.constant 0 : i32
    %c0_i32_0 = arith.constant 0 : i32
    %c0_i32_1 = arith.constant 0 : i32
    return %c0_i32, %c0_i32_0 : i32, i32
  }
  func.func @transform_5(%arg0: i32) -> (i32, i32) {
    %c0_i32 = arith.constant 0 : i32
    %c0_i32_0 = arith.constant 0 : i32
    %c0_i32_1 = arith.constant 0 : i32
    return %c0_i32, %c0_i32_0 : i32, i32
  }
  func.func @transform_6(%arg0: i32) -> (i32, i32) {
    %c0_i32 = arith.constant 0 : i32
    %c0_i32_0 = arith.constant 0 : i32
    %c0_i32_1 = arith.constant 0 : i32
    return %c0_i32, %c0_i32_0 : i32, i32
  }
  func.func @transform_7(%arg0: i32) -> (i32, i32) {
    %c0_i32 = arith.constant 0 : i32
    %c0_i32_0 = arith.constant 0 : i32
    return %c0_i32, %arg0 : i32, i32
  }
}

</mosaic_0001>

<bundles_post_ra>
// kernel: tpu_custom_call.1
= control target key start
LH: loop header
LB: loop body
LE: loop exit
PB: predicated region body
PF: predicated region fallthrough
CT: control target
= control target key end

     0   :  { %12 = vsyncpa [#allocation3], 0  ;;  %s4786_s0 = inlined_call_operand.hbm [shape: f32[3,8,32], index: 0, kind: input, shape index: {}]   ;;  %s4787_s1 = inlined_call_operand.hbm [shape: f32[3,8,8,64], index: 1, kind: input, shape index: {}]   ;;  %s4788_s2 = inlined_call_operand.hbm [shape: f32[64,64], index: 2, kind: input, shape index: {}]   ;;  %s4789_s3 = inlined_call_operand.hbm [shape: f32[32,64], index: 3, kind: input, shape index: {}]   ;;  %s4790_s4 = inlined_call_operand.hbm [shape: f32[32,32], index: 4, kind: input, shape index: {}]   ;;  %s4791_s5 = inlined_call_operand.hbm [shape: f32[32,64], index: 5, kind: input, shape index: {}]   ;;  %s4792_s6 = inlined_call_operand.vmem [shape: f32[8,128], index: 6, kind: input, shape index: {}]   ;;  %s4793_s7 = inlined_call_operand.hbm [shape: f32[2,8], index: 7, kind: output, shape index: {}]  }
   0x1   :  { %13 = vsyncpa [#allocation6], 0 }
   0x2   :  { %14 = vsyncpa [#allocation9], 0 }
   0x3   :  { %15 = vsyncpa [#allocation12], 0 }
   0x4   :  { %16 = vsyncpa [#allocation4], 0  ;;  %s3525_s24 = smov [#allocation5]   ;;  %s3526_s26 = smov [#allocation8]  }
   0x5   :  { %s34_s25 = sshll.u32 %s3525_s24, 4  ;;  %s58_s27 = sshll.u32 %s3526_s26, 4  ;;  %s35_s25 = int_to_ptr.vmem [resolvable:$true] %s34_s25  ;;  %s3582_s27 = int_to_ptr.vmem [resolvable:$true] %s58_s27 }
   0x6   :  { %s3361_s30 = scalar_lea.hbm %s4787_s1, 3072 }
   0x7   :  { %p3362_p0 = scmp.ne.s32.totalorder %s4787_s1, %s3361_s30  ;;  %p3365_p1 = scmp.lt.u32.totalorder %s3361_s30, %s4787_s1 }
   0x9   :  { %p3367_p2 = pnand %p3365_p1, %p3362_p0 }
   0xb   :  { %3370 = shalt.err (!%p3367_p2)
}
   0xc   :  { %s3371_s12 = scalar_lea.vmem %s35_s25, 3072  ;;  %p3376_p4 = scmp.lt.s32.totalorder %s35_s25, %s35_s25 }
   0xd   :  { %p3372_p3 = scmp.ne.s32.totalorder %s35_s25, %s3371_s12  ;;  %p3377_p5 = scmp.lt.s32.totalorder %s3371_s12, %s3371_s12 }
   0xf   :  { %p3378_p6 = por %p3377_p5, %p3376_p4 }
  0x11   :  { %p3379_p7 = pnand %p3378_p6, %p3372_p3 }
  0x13   :  { %3382 = shalt.err (!%p3379_p7)
}
  0x14   :  { %s3527_s13 = smov 128   ;;  %s3528_s14 = smov 8  }
  0x15   :  { %40 = dma.hbm_to_vmem [thread:$0]  %s4787_s1, 3072, %s35_s25, [#allocation6], %s3527_s13, %s3527_s13, %s3528_s14  }
  0x16   :  { %s3383_s19 = scalar_lea.hbm %s4789_s3, 512 }
  0x17   :  { %p3384_p8 = scmp.ne.s32.totalorder %s4789_s3, %s3383_s19  ;;  %p3387_p9 = scmp.lt.u32.totalorder %s3383_s19, %s4789_s3 }
  0x19   :  { %p3389_p10 = pnand %p3387_p9, %p3384_p8 }
  0x1b   :  { %3392 = shalt.err (!%p3389_p10)
}
  0x1c   :  { %s3393_s24 = scalar_lea.vmem %s3582_s27, 512  ;;  %p3398_p12 = scmp.lt.s32.totalorder %s3582_s27, %s3582_s27 }
  0x1d   :  { %p3394_p11 = scmp.ne.s32.totalorder %s3582_s27, %s3393_s24  ;;  %p3399_p13 = scmp.lt.s32.totalorder %s3393_s24, %s3393_s24 }
  0x1f   :  { %p3400_p0 = por %p3399_p13, %p3398_p12 }
  0x21   :  { %p3401_p1 = pnand %p3400_p0, %p3394_p11 }
  0x23   :  { %3404 = shalt.err (!%p3401_p1)
}
  0x24   :  { %64 = dma.hbm_to_vmem [thread:$0]  %s4789_s3, 512, %s3582_s27, [#allocation9], %s3527_s13, %s3527_s13, %s3528_s14  }
  0x25   :  { %s3529_s26 = smov [#allocation2]   ;;  %s3530_s29 = smov [#allocation7]  }
  0x26   :  { %s22_s28 = sshll.u32 %s3529_s26, 4  ;;  %s46_s30 = sshll.u32 %s3530_s29, 4  ;;  %s23_s28 = int_to_ptr.vmem [resolvable:$true] %s22_s28  ;;  %s3619_s30 = int_to_ptr.vmem [resolvable:$true] %s46_s30 }
  0x27   :  { %s3405_s10 = scalar_lea.hbm %s4786_s0, 384 }
  0x28   :  { %p3406_p2 = scmp.ne.s32.totalorder %s4786_s0, %s3405_s10  ;;  %p3409_p3 = scmp.lt.u32.totalorder %s3405_s10, %s4786_s0 }
  0x2a   :  { %p3411_p4 = pnand %p3409_p3, %p3406_p2 }
  0x2c   :  { %3414 = shalt.err (!%p3411_p4)
}
  0x2d   :  { %s3415_s3 = scalar_lea.vmem %s23_s28, 384  ;;  %p3420_p6 = scmp.lt.s32.totalorder %s23_s28, %s23_s28 }
  0x2e   :  { %p3416_p5 = scmp.ne.s32.totalorder %s23_s28, %s3415_s3  ;;  %p3421_p7 = scmp.lt.s32.totalorder %s3415_s3, %s3415_s3 }
  0x30   :  { %p3422_p8 = por %p3421_p7, %p3420_p6 }
  0x32   :  { %p3423_p9 = pnand %p3422_p8, %p3416_p5 }
  0x34   :  { %3426 = shalt.err (!%p3423_p9)
}
  0x35   :  { %28 = dma.hbm_to_vmem [thread:$0]  %s4786_s0, 384, %s23_s28, [#allocation3], %s3527_s13, %s3527_s13, %s3528_s14  }
  0x36   :  { %s3427_s20 = scalar_lea.hbm %s4788_s2, 1024 }
  0x37   :  { %p3428_p10 = scmp.ne.s32.totalorder %s4788_s2, %s3427_s20  ;;  %p3431_p11 = scmp.lt.u32.totalorder %s3427_s20, %s4788_s2 }
  0x39   :  { %p3433_p12 = pnand %p3431_p11, %p3428_p10 }
  0x3b   :  { %3436 = shalt.err (!%p3433_p12)
}
  0x3c   :  { %s3437_s1 = scalar_lea.vmem %s3619_s30, 1024  ;;  %p3442_p0 = scmp.lt.s32.totalorder %s3619_s30, %s3619_s30 }
  0x3d   :  { %p3438_p13 = scmp.ne.s32.totalorder %s3619_s30, %s3437_s1  ;;  %p3443_p1 = scmp.lt.s32.totalorder %s3437_s1, %s3437_s1 }
  0x3f   :  { %p3444_p2 = por %p3443_p1, %p3442_p0 }
  0x41   :  { %p3445_p3 = pnand %p3444_p2, %p3438_p13 }
  0x43   :  { %3448 = shalt.err (!%p3445_p3)
}
  0x44   :  { %52 = dma.hbm_to_vmem [thread:$0]  %s4788_s2, 1024, %s3619_s30, [#allocation6], %s3527_s13, %s3527_s13, %s3528_s14  }
  0x45   :  { %s3531_s26 = smov [#allocation10]   ;;  %s3532_s29 = smov [#allocation11]  }
  0x46   :  { %s70_s28 = sshll.u32 %s3531_s26, 4  ;;  %s82_s8 = sshll.u32 %s3532_s29, 4  ;;  %s71_s28 = int_to_ptr.vmem [resolvable:$true] %s70_s28  ;;  %s3656_s8 = int_to_ptr.vmem [resolvable:$true] %s82_s8 }
  0x47   :  { %s3449_s11 = scalar_lea.hbm %s4790_s4, 512 }
  0x48   :  { %p3450_p4 = scmp.ne.s32.totalorder %s4790_s4, %s3449_s11  ;;  %p3453_p5 = scmp.lt.u32.totalorder %s3449_s11, %s4790_s4 }
  0x4a   :  { %p3455_p6 = pnand %p3453_p5, %p3450_p4 }
  0x4c   :  { %3458 = shalt.err (!%p3455_p6)
}
  0x4d   :  { %s3459_s2 = scalar_lea.vmem %s71_s28, 512  ;;  %p3464_p8 = scmp.lt.s32.totalorder %s71_s28, %s71_s28 }
  0x4e   :  { %p3460_p7 = scmp.ne.s32.totalorder %s71_s28, %s3459_s2  ;;  %p3465_p9 = scmp.lt.s32.totalorder %s3459_s2, %s3459_s2 }
  0x50   :  { %p3466_p10 = por %p3465_p9, %p3464_p8 }
  0x52   :  { %p3467_p11 = pnand %p3466_p10, %p3460_p7 }
  0x54   :  { %3470 = shalt.err (!%p3467_p11)
}
  0x55   :  { %76 = dma.hbm_to_vmem [thread:$0]  %s4790_s4, 512, %s71_s28, [#allocation9], %s3527_s13, %s3527_s13, %s3528_s14  }
  0x56   :  { %s3471_s19 = scalar_lea.hbm %s4791_s5, 512 }
  0x57   :  { %p3472_p12 = scmp.ne.s32.totalorder %s4791_s5, %s3471_s19  ;;  %p3475_p13 = scmp.lt.u32.totalorder %s3471_s19, %s4791_s5 }
  0x59   :  { %p3477_p0 = pnand %p3475_p13, %p3472_p12 }
  0x5b   :  { %3480 = shalt.err (!%p3477_p0)
}
  0x5c   :  { %s3481_s24 = scalar_lea.vmem %s3656_s8, 512  ;;  %p3486_p2 = scmp.lt.s32.totalorder %s3656_s8, %s3656_s8 }
  0x5d   :  { %p3482_p1 = scmp.ne.s32.totalorder %s3656_s8, %s3481_s24  ;;  %p3487_p3 = scmp.lt.s32.totalorder %s3481_s24, %s3481_s24 }
  0x5f   :  { %p3488_p4 = por %p3487_p3, %p3486_p2 }
  0x61   :  { %p3489_p5 = pnand %p3488_p4, %p3482_p1 }
  0x63   :  { %3492 = shalt.err (!%p3489_p5)
}
  0x64   :  { %88 = dma.hbm_to_vmem [thread:$0]  %s4791_s5, 512, %s3656_s8, [#allocation12], %s3527_s13, %s3527_s13, %s3528_s14  }
  0x65   :  { %3515 = dma.done.wait [#allocation3], 384  }
  0x66   :  { %3516 = vsyncadd [#allocation3], 4294966912 }
  0x67   :  { %3517 = dma.done.wait [#allocation6], 4096  }
  0x68   :  { %3518 = vsyncadd [#allocation6], 4294963200 }
  0x69   :  { %3519 = dma.done.wait [#allocation9], 1024  }
  0x6a   :  { %3520 = vsyncadd [#allocation9], 4294966272 }
  0x6b   :  { %3521 = dma.done.wait [#allocation12], 512  }
  0x6c   :  { %3522 = vsyncadd [#allocation12], 4294966784  ;;  %v4796_v0 = vmov 0.0|0.0   ;;  %vm3534_vm0 = vmmov 0   ;;  %v4794_v1 = vmov 0.0   ;;  %v137_v2 = vld [vmem:[#allocation7] sm:$0xff]  ;;  %v145_v47 = vlaneseq }
  0x6d   :  { %3207 = vmatprep.subr.bf16.mxu1 %v4796_v0  ;;  %3148 = vmatprep.mubr.msk.f32.mxu1 %vm3534_vm0, %v4794_v1  ;;  %v138_v3 = vld [vmem:[#allocation7 + $0x8] sm:$0xff]  ;;  %v407_v4 = vld [vmem:[#allocation8] sm:$0xff]  ;;  %v139_v7 = vld [vmem:[#allocation7 + $0x10] sm:$0xff]  ;;  %vm149_vm1 = vcmask 523264   ;;  %vm415_vm2 = vcmask 261120   ;;  %vm799_vm3 = vcmask 130048  }
  0x6e   :  { %v3191_v5 = vpack.c.bf16 %v138_v3, %v137_v2  ;;  %v408_v6 = vld [vmem:[#allocation8 + $0x8] sm:$0xff]  ;;  %v140_v8 = vld [vmem:[#allocation7 + $0x18] sm:$0xff]  ;;  %v409_v11 = vld [vmem:[#allocation8 + $0x10] sm:$0xff]  ;;  %v3732_v48 = vshrl.u32 %v145_v47, 7  ;;  %v3536_v49 = vmov 1966171168  }
  0x6f   :  { %v3208_v9 = vpack.c.bf16 %v408_v6, %v407_v4  ;;  %v3195_v10 = vpack.c.bf16 %v140_v8, %v139_v7  ;;  %v410_v12 = vld [vmem:[#allocation8 + $0x18] sm:$0xff]  ;;  %v141_v13 = vld [vmem:[#allocation7 + $0x20] sm:$0xff]  ;;  %v142_v14 = vld [vmem:[#allocation7 + $0x28] sm:$0xff]  ;;  %v510_v50 = vunpack.c.l.s4 %v3536_v49  ;;  %s3537_s14 = smov 112   ;;  %vm1090_vm4 = vcmask 1041409   ;;  %s3539_s0 = smov 96  }
  0x70   :  { %3192 = vmatprep.subr.bf16.mxu0 %v3191_v5  ;;  %v3211_v15 = vpack.c.bf16 %v410_v12, %v409_v11  ;;  %v113_v16 = vld [vmem:[#allocation5] sm:$0xff]  ;;  %v3199_v17 = vpack.c.bf16 %v142_v14, %v141_v13  ;;  %v143_v18 = vld [vmem:[#allocation7 + $0x30] sm:$0xff]  ;;  %v144_v19 = vld [vmem:[#allocation7 + $0x38] sm:$0xff]  ;;  %v3735_v51 = vsub.s32 1, %v3732_v48  ;;  %v3745_v57 = vsub.s32 0, %v3732_v48  ;;  %s3540_s25 = smov 32  }
  0x71   :  { %3209 = vmatpush3.bf16.msra.mxu1 %v3208_v9  ;;  %3194 = vmatpush3.bf16.msra.mxu0 %v3191_v5  ;;  %v110_v20 = vld [vmem:[#allocation2] sm:$0xff]  ;;  %v3203_v21 = vpack.c.bf16 %v144_v19, %v143_v18  ;;  %v111_v22 = vld [vmem:[#allocation2 + $0x8] sm:$0xff]  ;;  %v112_v24 = vld [vmem:[#allocation2 + $0x10] sm:$0xff]  ;;  %v511_v53 = vunpack.c.0.s8 %v510_v50  ;;  %vm1092_vm5 = vcmask 1042434   ;;  %vm1094_vm6 = vcmask 1043459   ;;  %s3541_s29 = smov [#allocation13]  }
  0x72   :  { %3210 = vmatprep.subr.bf16.mxu1 %v4796_v0  ;;  %3196 = vmatprep.subr.bf16.mxu0 %v3195_v10  ;;  %v114_v23 = vld [vmem:[#allocation5 + $0x8] sm:$0xff]  ;;  %v115_v25 = vld [vmem:[#allocation5 + $0x10] sm:$0xff]  ;;  %v116_v26 = vld [vmem:[#allocation5 + $0x18] sm:$0xff]  ;;  %vm1096_vm7 = vcmask 1044484   ;;  %vm1098_vm8 = vcmask 1045509   ;;  %vm1100_vm9 = vcmask 1046534  }
  0x73   :  { %3104 = vmatprep.mubr.msk.f32.mxu0 %vm149_vm1, %v113_v16  ;;  %v117_v27 = vld [vmem:[#allocation5 + $0x20] sm:$0xff]  ;;  %v118_v28 = vld [vmem:[#allocation5 + $0x28] sm:$0xff]  ;;  %v119_v29 = vld [vmem:[#allocation5 + $0x30] sm:$0xff]  ;;  %v3742_v55 = vsub.s32 %v511_v53, %v3732_v48  ;;  %vm1102_vm10 = vcmask 1047559   ;;  %vm1121_vm11 = vcmask 64512   ;;  %vm1425_vm12 = vcmask 392448  }
  0x74   :  { %v120_v30 = vld [vmem:[#allocation5 + $0x38] sm:$0xff]  ;;  %v121_v31 = vld [vmem:[#allocation5 + $0x40] sm:$0xff]  ;;  %v122_v32 = vld [vmem:[#allocation5 + $0x48] sm:$0xff]  ;;  %vm2305_vm13 = vcmask 523648   ;;  %s2942_s8 = sshll.u32 %s3541_s29, 4  ;;  %vm2934_vm14 = vcmask 58368   ;;  %s2943_s8 = int_to_ptr.vmem [resolvable:$true] %s2942_s8 }
  0x75   :  { %3212 = vmatpush3.bf16.msra.mxu1 %v3211_v15  ;;  %3198 = vmatpush3.bf16.msra.mxu0 %v3195_v10  ;;  %v123_v33 = vld [vmem:[#allocation5 + $0x50] sm:$0xff]  ;;  %v124_v34 = vld [vmem:[#allocation5 + $0x58] sm:$0xff]  ;;  %v125_v35 = vld [vmem:[#allocation5 + $0x60] sm:$0xff]  ;;  %s3493_s9 = scalar_lea.vmem %s2943_s8, 32  ;;  %p3498_p7 = scmp.lt.s32.totalorder %s2943_s8, %s2943_s8 }
  0x76   :  { %3200 = vmatprep.subr.bf16.mxu0 %v3199_v17  ;;  %3213 = vmatprep.subr.bf16.mxu1 %v4796_v0  ;;  %v126_v36 = vld [vmem:[#allocation5 + $0x68] sm:$0xff]  ;;  %v127_v37 = vld [vmem:[#allocation5 + $0x70] sm:$0xff]  ;;  %v128_v38 = vld [vmem:[#allocation5 + $0x78] sm:$0xff]  ;;  %p3494_p6 = scmp.ne.s32.totalorder %s2943_s8, %s3493_s9  ;;  %p3499_p8 = scmp.lt.s32.totalorder %s3493_s9, %s3493_s9 }
  0x77   :  { %v129_v39 = vld [vmem:[#allocation5 + $0x80] sm:$0xff]  ;;  %v130_v40 = vld [vmem:[#allocation5 + $0x88] sm:$0xff]  ;;  %v131_v41 = vld [vmem:[#allocation5 + $0x90] sm:$0xff] }
  0x78   :  { %3149 = vmatmul.mubr.msk.f32.vlgmr.msra.gmra.mrb[0].mxu1 %vm415_vm2, %v110_v20  ;;  %v132_v42 = vld [vmem:[#allocation5 + $0x98] sm:$0xff]  ;;  %v133_v43 = vld [vmem:[#allocation5 + $0xa0] sm:$0xff]  ;;  %v134_v44 = vld [vmem:[#allocation5 + $0xa8] sm:$0xff]  ;;  %p3500_p9 = por %p3499_p8, %p3498_p7 }
  0x79   :  { %3202 = vmatpush3.bf16.msra.mxu0 %v3199_v17  ;;  %3151 = vmatprep.mubr.msk.f32.mxu1 %vm3534_vm0, %v4794_v1  ;;  %v135_v45 = vld [vmem:[#allocation5 + $0xb0] sm:$0xff]  ;;  %v136_v46 = vld [vmem:[#allocation5 + $0xb8] sm:$0xff]  ;;  %v109_v52 = vld [vmem:[%s4792_s6] sm:$0xff] }
  0x7a   :  { %3204 = vmatprep.subr.bf16.mxu0 %v3203_v21  ;;  %v414_v54 = vrot.slane %v109_v52, %v3735_v51  ;;  %v3752_v62 = vrot.slane %v109_v52, %v3745_v57  ;;  %p3501_p10 = pnand %p3500_p9, %p3494_p6 }
  0x7c   :  { %3152 = vmatmul.mubr.msk.f32.gmra.mrb[2].mxu1 %vm415_vm2, %v111_v22 }
  0x7d   :  { %3206 = vmatpush3.bf16.msra.mxu0 %v3203_v21  ;;  %3154 = vmatprep.mubr.msk.f32.mxu1 %vm3534_vm0, %v4794_v1 }
  0x80   :  { %3105 = vmatmul.mubr.msk.f32.vlgmr.msra.gmra.mrb[0].mxu0 %vm149_vm1, %v114_v23  ;;  %3155 = vmatmul.mubr.msk.f32.gmra.mrb[4].mxu1 %vm415_vm2, %v112_v24 }
  0x81   :  { %3107 = vmatprep.mubr.msk.f32.mxu0 %vm149_vm1, %v115_v25  ;;  %3165 = vmatprep.mubr.msk.f32.mxu1 %vm3534_vm0, %v4794_v1 }
  0x84   :  { %3108 = vmatmul.mubr.msk.f32.gmra.mrb[2].mxu0 %vm149_vm1, %v116_v26 }
  0x85   :  { %3110 = vmatprep.mubr.msk.f32.mxu0 %vm149_vm1, %v117_v27 }
  0x88   :  { %3111 = vmatmul.mubr.msk.f32.gmra.mrb[4].mxu0 %vm149_vm1, %v118_v28 }
  0x89   :  { %3113 = vmatprep.mubr.msk.f32.mxu0 %vm149_vm1, %v119_v29 }
  0x8c   :  { %3114 = vmatmul.mubr.msk.f32.gmra.mrb[6].mxu0 %vm149_vm1, %v120_v30 }
  0x8d   :  { %3116 = vmatprep.mubr.msk.f32.mxu0 %vm149_vm1, %v121_v31 }
  0x90   :  { %3117 = vmatmul.mubr.msk.f32.gmra.mrb[8].mxu0 %vm149_vm1, %v122_v32 }
  0x91   :  { %3119 = vmatprep.mubr.msk.f32.mxu0 %vm149_vm1, %v123_v33 }
  0x94   :  { %3120 = vmatmul.mubr.msk.f32.gmra.mrb[10].mxu0 %vm149_vm1, %v124_v34 }
  0x95   :  { %3122 = vmatprep.mubr.msk.f32.mxu0 %vm149_vm1, %v125_v35 }
  0x98   :  { %3123 = vmatmul.mubr.msk.f32.gmra.mrb[12].mxu0 %vm149_vm1, %v126_v36 }
  0x99   :  { %3125 = vmatprep.mubr.msk.f32.mxu0 %vm149_vm1, %v127_v37 }
  0x9c   :  { %3126 = vmatmul.mubr.msk.f32.gmra.mrb[14].mxu0 %vm149_vm1, %v128_v38 }
  0x9d   :  { %3128 = vmatprep.mubr.msk.f32.mxu0 %vm149_vm1, %v129_v39 }
  0xa0   :  { %3129 = vmatmul.mubr.msk.f32.gmra.mrb[16].mxu0 %vm149_vm1, %v130_v40 }
  0xa1   :  { %3131 = vmatprep.mubr.msk.f32.mxu0 %vm149_vm1, %v131_v41 }
  0xa4   :  { %3132 = vmatmul.mubr.msk.f32.gmra.mrb[18].mxu0 %vm149_vm1, %v132_v42 }
  0xa5   :  { %3134 = vmatprep.mubr.msk.f32.mxu0 %vm149_vm1, %v133_v43 }
  0xa8   :  { %3135 = vmatmul.mubr.msk.f32.gmra.mrb[20].mxu0 %vm149_vm1, %v134_v44 }
  0xa9   :  { %3137 = vmatprep.mubr.msk.f32.mxu0 %vm149_vm1, %v135_v45 }
  0xac   :  { %3138 = vmatmul.mubr.msk.f32.gmra.mrb[22].mxu0 %vm149_vm1, %v136_v46 }
 0x14b   :  { %v491_v56 = vpop.f32.mrb[0].mxu1 }
 0x14c   :  { %v3747_v58 = vadd.f32 %v491_v56, %v414_v54  ;;  %v3150_v59 = vpop.f32.mrb[1].mxu1 }
 0x14e   :  { %4845 = vst [vmem:[#allocation19_spill] sm:$0xff] %v3747_v58  ;;  %v515_v60 = vrot.slane %v3747_v58, %v3742_v55  ;;  %v508_v43 = vcombine.high %v3747_v58, %v3747_v58 }
 0x14f   :  { %v496_v61 = vpop.f32.mrb[2].mxu1 }
 0x150   :  { %v523_v63 = vcombine.high %v515_v60, %v515_v60  ;;  %v3754_v2 = vadd.f32 %v496_v61, %v414_v54  ;;  %v3153_v3 = vpop.f32.mrb[3].mxu1  ;;  %v531_v6 = vrot.slane %v515_v60, %v3742_v55  ;;  %v522_v44 = vrot.slane %v508_v43, %v3742_v55 }
 0x152   :  { %4846 = vst [vmem:[#allocation20_spill] sm:$0xff] %v3754_v2  ;;  %v545_v4 = vrot.slane %v523_v63, %v3742_v55  ;;  %v658_v15 = vrot.slane %v531_v6, %v3745_v57  ;;  %v553_v29 = vcombine.high %v531_v6, %v531_v6  ;;  %v524_v45 = vcombine.high %v522_v44, %v522_v44 }
 0x153   :  { %v3106_v5 = vpop.f32.mrb[0].mxu0  ;;  %v501_v17 = vpop.f32.mrb[4].mxu1  ;;  %v538_v46 = vrot.slane %v522_v44, %v3742_v55  ;;  %v564_v53 = vrot.slane %v3754_v2, %v3742_v55 }
 0x154   :  { %v3759_v7 = vadd.f32 %v3106_v5, %v3752_v62  ;;  %v288_v8 = vpop.f32.mrb[1].mxu0  ;;  %v662_v9 = vrot.slane %v545_v4, %v3745_v57  ;;  %v3770_v19 = vadd.f32 %v501_v17, %v414_v54  ;;  %v3156_v20 = vpop.f32.mrb[5].mxu1  ;;  %v555_v24 = vcombine.high %v545_v4, %v545_v4 }
 0x155   :  { %v3763_v10 = vadd.f32 %v288_v8, %v3752_v62  ;;  %v666_v34 = vrot.slane %v553_v29, %v3745_v57  ;;  %v552_v49 = vrot.slane %v524_v45, %v3742_v55  ;;  %v674_v52 = vrot.slane %v538_v46, %v3745_v57 }
 0x156   :  { %4847 = vst [vmem:[#allocation21_spill] sm:$0xff] %v3759_v7  ;;  %v776_v11 = vmul.f32 %v662_v9, %v3759_v7  ;;  %4848 = vst [vmem:[#allocation22_spill] sm:$0xff] %v3770_v19  ;;  %v670_v28 = vrot.slane %v555_v24, %v3745_v57  ;;  %v580_v60 = vrot.slane %v564_v53, %v3742_v55 }
 0x157   :  { %v3109_v12 = vpop.f32.mrb[2].mxu0  ;;  %v775_v16 = vmul.f32 %v658_v15, %v3763_v10  ;;  %v556_v54 = vcombine.high %v552_v49, %v552_v49  ;;  %v554_v3 = vcombine.high %v538_v46, %v538_v46 }
 0x158   :  { %v298_v13 = vpop.f32.mrb[3].mxu0  ;;  %1620 = vrot.lane.b32.xlu0 %v776_v11, %s3537_s14  ;;  %v803_v14 = vsel %vm799_vm3, %v776_v11, 0.0  ;;  %v3776_v26 = vadd.f32 %v3109_v12, %v3752_v62  ;;  %v690_v11 = vrot.slane %v580_v60, %v3745_v57 }
 0x159   :  { %804 = vadd.xlane.f32.xlu1 %v803_v14  ;;  %v3780_v31 = vadd.f32 %v298_v13, %v3752_v62  ;;  %v800_v42 = vsel %vm799_vm3, %v775_v16, 0.0  ;;  %v686_v63 = vrot.slane %v556_v54, %v3745_v57  ;;  %v682_v9 = vrot.slane %v554_v3, %v3745_v57 }
 0x15a   :  { %v778_v32 = vmul.f32 %v670_v28, %v3776_v26 }
 0x15b   :  { %v3112_v18 = vpop.f32.mrb[4].mxu0  ;;  %v777_v36 = vmul.f32 %v666_v34, %v3780_v31 }
 0x15c   :  { %v308_v21 = vpop.f32.mrb[5].mxu0  ;;  %1618 = vrot.lane.b32.xlu0 %v775_v16, %s3537_s14  ;;  %v809_v61 = vsel %vm799_vm3, %v778_v32, 0.0  ;;  %v3843_v20 = vadd.f32 %v3112_v18, %v3752_v62 }
 0x15d   :  { %v3806_v50 = vadd.f32 %v308_v21, %v3752_v62  ;;  %v806_v6 = vsel %vm799_vm3, %v777_v36, 0.0  ;;  %v678_v21 = vrot.slane %v552_v49, %v3745_v57  ;;  %v557_v49 = vcombine.high %v3754_v2, %v3754_v2 }
 0x15e   :  { %4852 = vst [vmem:[#allocation26_spill] sm:$0xff] %v3843_v20 }
 0x15f   :  { %v3115_v22 = vpop.f32.mrb[6].mxu0  ;;  %v779_v59 = vmul.f32 %v674_v52, %v3806_v50  ;;  %v571_v52 = vrot.slane %v557_v49, %v3742_v55 }
 0x160   :  { %v318_v23 = vpop.f32.mrb[7].mxu0  ;;  %v3812_v56 = vadd.f32 %v3115_v22, %v3752_v62  ;;  %v780_v22 = vmul.f32 %v678_v21, %v3843_v20 }
 0x161   :  { %v3820_v4 = vadd.f32 %v318_v23, %v3752_v62  ;;  %v572_v23 = vcombine.high %v564_v53, %v564_v53  ;;  %v812_v54 = vsel %vm799_vm3, %v779_v59, 0.0 }
 0x162   :  { %4849 = vst [vmem:[#allocation23_spill] sm:$0xff] %v3812_v56  ;;  %v782_v5 = vmul.f32 %v686_v63, %v3812_v56  ;;  %v815_v53 = vsel %vm799_vm3, %v780_v22, 0.0 }
 0x163   :  { %v3773_v25 = vpop.f32.mrb[8].mxu0  ;;  %4850 = vst [vmem:[#allocation24_spill] sm:$0xff] %v3820_v4  ;;  %v781_v13 = vmul.f32 %v682_v9, %v3820_v4  ;;  %v594_v24 = vrot.slane %v572_v23, %v3742_v55 }
 0x164   :  { %v328_v27 = vpop.f32.mrb[9].mxu0  ;;  %v821_v63 = vsel %vm799_vm3, %v782_v5, 0.0 }
 0x165   :  { %v3826_v8 = vadd.f32 %v328_v27, %v3752_v62  ;;  %v604_v27 = vcombine.high %v594_v24, %v594_v24 }
 0x167   :  { %v3121_v30 = vpop.f32.mrb[10].mxu0  ;;  %4851 = vst [vmem:[#allocation25_spill] sm:$0xff] %v3826_v8  ;;  %v783_v16 = vmul.f32 %v690_v11, %v3826_v8  ;;  %v702_v29 = vrot.slane %v604_v27, %v3745_v57  ;;  %v613_v11 = vrot.slane %v3770_v19, %v3742_v55 }
 0x168   :  { %v338_v33 = vpop.f32.mrb[11].mxu0  ;;  %v3850_v28 = vadd.f32 %v3121_v30, %v3752_v62 }
 0x16a   :  { %1624 = vrot.lane.b32.xlu1 %v778_v32, %s3537_s14  ;;  %4853 = vst [vmem:[#allocation27_spill] sm:$0xff] %v3850_v28  ;;  %v602_v32 = vcombine.high %v580_v60, %v580_v60  ;;  %v786_v43 = vmul.f32 %v702_v29, %v3850_v28  ;;  %v587_v60 = vrot.slane %v571_v52, %v3742_v55 }
 0x16b   :  { %v3785_v35 = vpop.f32.mrb[12].mxu0 }
 0x16c   :  { %v3788_v37 = vpop.f32.mrb[13].mxu0  ;;  %v698_v44 = vrot.slane %v602_v32, %v3745_v57  ;;  %v833_v30 = vsel %vm799_vm3, %v786_v43, 0.0 }
 0x16d   :  { %v3876_v3 = vadd.f32 %v3788_v37, %v3752_v62  ;;  %v629_v37 = vrot.slane %v613_v11, %v3742_v55 }
 0x16e   :  { %1622 = vrot.lane.b32.xlu1 %v777_v36, %s3537_s14  ;;  %v824_v36 = vsel %vm799_vm3, %v783_v16, 0.0 }
 0x16f   :  { %v3791_v38 = vpop.f32.mrb[14].mxu0  ;;  %4855 = vst [vmem:[#allocation29_spill] sm:$0xff] %v3876_v3  ;;  %v722_v32 = vrot.slane %v629_v37, %v3745_v57 }
 0x170   :  { %v3793_v39 = vpop.f32.mrb[15].mxu0  ;;  %v3884_v21 = vadd.f32 %v3791_v38, %v3752_v62 }
 0x171   :  { %v3892_v23 = vadd.f32 %v3793_v39, %v3752_v62  ;;  %v3910_v39 = vadd.f32 %v3773_v25, %v3752_v62  ;;  %v606_v25 = vcombine.high %v3770_v19, %v3770_v19 }
 0x172   :  { %4856 = vst [vmem:[#allocation30_spill] sm:$0xff] %v3884_v21 }
 0x173   :  { %v3795_v40 = vpop.f32.mrb[16].mxu0  ;;  %4857 = vst [vmem:[#allocation31_spill] sm:$0xff] %v3892_v23  ;;  %4859 = vst [vmem:[#allocation33_spill] sm:$0xff] %v3910_v39 }
 0x174   :  { %v3797_v41 = vpop.f32.mrb[17].mxu0 }
 0x175   :  { %v3902_v38 = vadd.f32 %v3797_v41, %v3752_v62 }
 0x177   :  { %v3830_v12 = vpop.f32.mrb[18].mxu0  ;;  %4858 = vst [vmem:[#allocation32_spill] sm:$0xff] %v3902_v38 }
 0x178   :  { %v3833_v14 = vpop.f32.mrb[19].mxu0 }
 0x17b   :  { %801 = vadd.xlane.f32.xlu0 %v800_v42  ;;  %v3835_v15 = vpop.f32.mrb[20].mxu0  ;;  %v3859_v42 = vadd.f32 %v338_v33, %v3752_v62  ;;  %v573_v33 = vcombine.high %v571_v52, %v571_v52 }
 0x17c   :  { %v3839_v17 = vpop.f32.mrb[21].mxu0 }
 0x17d   :  { %4854 = vst [vmem:[#allocation28_spill] sm:$0xff] %v3859_v42  ;;  %v785_v45 = vmul.f32 %v698_v44, %v3859_v42  ;;  %v791_v44 = vmul.f32 %v722_v32, %v3902_v38  ;;  %v3930_v52 = vadd.f32 %v3839_v17, %v3752_v62 }
 0x17f   :  { %v3853_v34 = vpop.f32.mrb[22].mxu0  ;;  %v830_v46 = vsel %vm799_vm3, %v785_v45, 0.0  ;;  %v848_v41 = vsel %vm799_vm3, %v791_v44, 0.0  ;;  %4860 = vst [vmem:[#allocation34_spill] sm:$0xff] %v3930_v52 }
 0x180   :  { %v3855_v18 = vpop.f32.mrb[23].mxu0 }
 0x191   :  { %1626 = vrot.lane.b32.xlu0 %v779_v59, %s3537_s14  ;;  %v818_v59 = vsel %vm799_vm3, %v781_v13, 0.0 }
 0x192   :  { %810 = vadd.xlane.f32.xlu1 %v809_v61  ;;  %v601_v61 = vrot.slane %v573_v33, %v3742_v55 }
 0x194   :  { %v605_v9 = vcombine.high %v601_v61, %v601_v61 }
 0x195   :  { %1632 = vrot.lane.b32.xlu0 %v782_v5, %s3537_s14 }
 0x196   :  { %807 = vadd.xlane.f32.xlu1 %v806_v6  ;;  %v706_v6 = vrot.slane %v587_v60, %v3745_v57 }
 0x198   :  { %v787_v5 = vmul.f32 %v706_v6, %v3876_v3  ;;  %v651_v6 = vcombine.high %v629_v37, %v629_v37 }
 0x199   :  { %1630 = vrot.lane.b32.xlu0 %v781_v13, %s3537_s14 }
 0x19a   :  { %v836_v32 = vsel %vm799_vm3, %v787_v5, 0.0 }
 0x19d   :  { %1634 = vrot.lane.b32.xlu0 %v783_v16, %s3537_s14  ;;  %v603_v16 = vcombine.high %v587_v60, %v587_v60  ;;  %v710_v60 = vrot.slane %v601_v61, %v3745_v57  ;;  %v3955_v61 = vadd.f32 %v3830_v12, %v3752_v62  ;;  %v3966_v12 = vadd.f32 %v3855_v18, %v3752_v62 }
 0x19f   :  { %v714_v13 = vrot.slane %v603_v16, %v3745_v57  ;;  %v3950_v16 = vadd.f32 %v3833_v14, %v3752_v62  ;;  %4863 = vst [vmem:[#allocation37_spill] sm:$0xff] %v3955_v61  ;;  %4864 = vst [vmem:[#allocation38_spill] sm:$0xff] %v3966_v12 }
 0x1a1   :  { %v3905_v29 = vmul.f32 %v714_v13, %v3892_v23  ;;  %4862 = vst [vmem:[#allocation36_spill] sm:$0xff] %v3950_v16 }
 0x1a7   :  { %1628 = vrot.lane.b32.xlu1 %v780_v22, %s3537_s14  ;;  %v718_v22 = vrot.slane %v605_v9, %v3745_v57 }
 0x1a9   :  { %v3895_v27 = vmul.f32 %v718_v22, %v3884_v21 }
 0x1bc   :  { %825 = vadd.xlane.f32.xlu0 %v824_v36  ;;  %v694_v36 = vrot.slane %v594_v24, %v3745_v57 }
 0x1c0   :  { %834 = vadd.xlane.f32.xlu0 %v833_v30  ;;  %v784_v30 = vmul.f32 %v694_v36, %v3910_v39 }
 0x1c2   :  { %v827_v24 = vsel %vm799_vm3, %v784_v30, 0.0 }
 0x1c4   :  { %831 = vadd.xlane.f32.xlu0 %v830_v46  ;;  %v3923_v46 = vrot.slane %v606_v25, %v3742_v55  ;;  %v3978_v25 = vadd.f32 %v3795_v40, %v3752_v62 }
 0x1c6   :  { %v636_v49 = vrot.slane %v3923_v46, %v3742_v55  ;;  %4865 = vst [vmem:[#allocation39_spill] sm:$0xff] %v3978_v25 }
 0x1c8   :  { %v738_v33 = vrot.slane %v636_v49, %v3745_v57  ;;  %v652_v13 = vcombine.high %v636_v49, %v636_v49 }
 0x1ca   :  { %v746_v36 = vrot.slane %v652_v13, %v3745_v57 }
 0x1cb   :  { %816 = vadd.xlane.f32.xlu1 %v815_v53  ;;  %v3934_v53 = vmul.f32 %v738_v33, %v3930_v52 }
 0x1cf   :  { %813 = vadd.xlane.f32.xlu1 %v812_v54  ;;  %v3941_v54 = vadd.f32 %v3785_v35, %v3752_v62 }
 0x1d1   :  { %4861 = vst [vmem:[#allocation35_spill] sm:$0xff] %v3941_v54  ;;  %v788_v17 = vmul.f32 %v710_v60, %v3941_v54 }
 0x1d3   :  { %822 = vadd.xlane.f32.xlu1 %v821_v63  ;;  %v621_v63 = vcombine.high %v613_v11, %v613_v11  ;;  %v839_v14 = vsel %vm799_vm3, %v788_v17, 0.0 }
 0x1d5   :  { %v643_v9 = vrot.slane %v621_v63, %v3742_v55 }
 0x1d7   :  { %819 = vadd.xlane.f32.xlu1 %v818_v59  ;;  %v653_v35 = vcombine.high %v643_v9, %v643_v9 }
 0x1d9   :  { %v734_v59 = vrot.slane %v653_v35, %v3745_v57 }
 0x1da   :  { %1642 = vrot.lane.b32.xlu0 %v787_v5, %s3537_s14  ;;  %v726_v5 = vrot.slane %v643_v9, %v3745_v57 }
 0x1db   :  { %v794_v22 = vmul.f32 %v734_v59, %v3955_v61 }
 0x1dc   :  { %v792_v18 = vmul.f32 %v726_v5, %v3978_v25 }
 0x1dd   :  { %v857_v37 = vsel %vm799_vm3, %v794_v22, 0.0 }
 0x1de   :  { %1648 = vrot.lane.b32.xlu0 %v3895_v27, %s3537_s14 }
 0x1e2   :  { %1646 = vrot.lane.b32.xlu0 %v3905_v29, %s3537_s14 }
 0x1e6   :  { %1650 = vrot.lane.b32.xlu0 %v791_v44, %s3537_s14  ;;  %v3969_v44 = vpop.xlane.xlu1 %804 }
 0x1e8   :  { %1636 = vrot.lane.b32.xlu1 %v784_v30, %s3537_s14  ;;  %v3972_v30 = vmul.f32 %v746_v36, %v3966_v12 }
 0x205   :  { %849 = vadd.xlane.f32.xlu0 %v848_v41  ;;  %v1625_v41 = vpop.permute.xlu1 %1624 }
 0x206   :  { %v1699_v35 = vsel %vm799_vm3, %v1625_v41, 0.0 }
 0x20c   :  { %828 = vadd.xlane.f32.xlu1 %v827_v24  ;;  %v1623_v24 = vpop.permute.xlu1 %1622 }
 0x21b   :  { %1658 = vrot.lane.b32.xlu0 %v3934_v53, %s3537_s14 }
 0x21d   :  { %1640 = vrot.lane.b32.xlu1 %v786_v43, %s3537_s14  ;;  %v730_v43 = vrot.slane %v651_v6, %v3745_v57 }
 0x21f   :  { %v3983_v49 = vpop.xlane.xlu1 %810 }
 0x221   :  { %1638 = vrot.lane.b32.xlu1 %v785_v45, %s3537_s14  ;;  %v793_v45 = vmul.f32 %v730_v43, %v3950_v16 }
 0x223   :  { %v854_v11 = vsel %vm799_vm3, %v793_v45, 0.0  ;;  %v3985_v33 = vpop.xlane.xlu1 %807 }
 0x225   :  { %1644 = vrot.lane.b32.xlu1 %v788_v17, %s3537_s14  ;;  %v1621_v17 = vpop.permute.xlu0 %1620 }
 0x226   :  { %v1693_v6 = vsel %vm799_vm3, %v1621_v17, 0.0 }
 0x227   :  { %v1629_v60 = vpop.permute.xlu1 %1628 }
 0x228   :  { %v1705_v36 = vsel %vm799_vm3, %v1629_v60, 0.0  ;;  %v4011_v60 = vadd.f32 %v3835_v15, %v3752_v62 }
 0x229   :  { %v1619_v43 = vpop.permute.xlu0 %1618 }
 0x22a   :  { %v1690_v9 = vsel %vm799_vm3, %v1619_v43, 0.0  ;;  %4866 = vst [vmem:[#allocation40_spill] sm:$0xff] %v4011_v60 }
 0x22d   :  { %v802_v59 = vpop.xlane.xlu0 %801 }
 0x23a   :  { %855 = vadd.xlane.f32.xlu0 %v854_v11 }
 0x23e   :  { %858 = vadd.xlane.f32.xlu0 %v857_v37  ;;  %v1696_v37 = vsel %vm799_vm3, %v1623_v24, 0.0  ;;  %v622_v24 = vcombine.high %v3923_v46, %v3923_v46  ;;  %v4019_v46 = vadd.f32 %v3853_v34, %v3752_v62 }
 0x240   :  { %4867 = vst [vmem:[#allocation41_spill] sm:$0xff] %v4019_v46 }
 0x249   :  { %840 = vadd.xlane.f32.xlu1 %v839_v14  ;;  %v1627_v14 = vpop.permute.xlu0 %1626 }
 0x24a   :  { %v1702_v5 = vsel %vm799_vm3, %v1627_v14, 0.0 }
 0x24d   :  { %837 = vadd.xlane.f32.xlu1 %v836_v32  ;;  %v851_v32 = vsel %vm799_vm3, %v792_v18, 0.0  ;;  %v1633_v17 = vpop.permute.xlu0 %1632 }
 0x251   :  { %v1631_v43 = vpop.permute.xlu0 %1630 }
 0x254   :  { %1662 = vrot.lane.b32.xlu0 %v3972_v30, %s3537_s14 }
 0x258   :  { %v3987_v63 = vpop.xlane.xlu1 %816 }
 0x25c   :  { %v3990_v40 = vpop.xlane.xlu1 %813 }
 0x25e   :  { %1652 = vrot.lane.b32.xlu1 %v792_v18, %s3537_s14  ;;  %v650_v18 = vrot.slane %v622_v24, %v3742_v55 }
 0x260   :  { %v3994_v11 = vpop.xlane.xlu1 %822 }
 0x264   :  { %v3997_v13 = vpop.xlane.xlu1 %819 }
 0x268   :  { %v1637_v41 = vpop.permute.xlu1 %1636 }
 0x273   :  { %1694 = vadd.xlane.f32.xlu0 %v1693_v6  ;;  %v1717_v6 = vsel %vm799_vm3, %v1637_v41, 0.0 }
 0x277   :  { %1691 = vadd.xlane.f32.xlu0 %v1690_v9  ;;  %v4005_v9 = vpop.permute.xlu0 %1634 }
 0x27b   :  { %1700 = vadd.xlane.f32.xlu0 %v1699_v35  ;;  %v742_v35 = vrot.slane %v650_v18, %v3745_v57  ;;  %v4014_v14 = vpop.xlane.xlu0 %825 }
 0x27d   :  { %v796_v55 = vmul.f32 %v742_v35, %v4011_v60 }
 0x27f   :  { %1697 = vadd.xlane.f32.xlu0 %v1696_v37  ;;  %v654_v37 = vcombine.high %v650_v18, %v650_v18  ;;  %v4026_v15 = vpop.xlane.xlu0 %834 }
 0x282   :  { %852 = vadd.xlane.f32.xlu1 %v851_v32 }
 0x283   :  { %1706 = vadd.xlane.f32.xlu0 %v1705_v36  ;;  %v4035_v41 = vpop.xlane.xlu0 %831 }
 0x287   :  { %1703 = vadd.xlane.f32.xlu0 %v1702_v5  ;;  %v1643_v18 = vpop.permute.xlu0 %1642 }
 0x288   :  { %v1726_v35 = vsel %vm799_vm3, %v1643_v18, 0.0 }
 0x28b   :  { %1718 = vadd.xlane.f32.xlu0 %v1717_v6 }
 0x293   :  { %1656 = vrot.lane.b32.xlu1 %v794_v22, %s3537_s14  ;;  %v750_v22 = vrot.slane %v654_v37, %v3745_v57  ;;  %v842_v37 = vsel %vm799_vm3, %v3905_v29, 0.0  ;;  %v2985_v29 = vclamps-f32 %v3990_v40, 10.0  ;;  %v1708_v40 = vsel %vm799_vm3, %v1631_v43, 0.0 }
 0x295   :  { %v4029_v5 = vmul.f32 %v750_v22, %v4019_v46  ;;  %v845_v22 = vsel %vm799_vm3, %v3895_v27, 0.0  ;;  %v2984_v27 = vclamps-f32 %v3983_v49, 10.0 }
 0x297   :  { %1654 = vrot.lane.b32.xlu1 %v793_v45, %s3537_s14 }
 0x299   :  { %v4021_v32 = vpop.xlane.xlu1 %828 }
 0x29b   :  { %1660 = vrot.lane.b32.xlu1 %v796_v55, %s3537_s14 }
 0x29d   :  { %v1641_v36 = vpop.permute.xlu1 %1640 }
 0x29e   :  { %v1723_v45 = vsel %vm799_vm3, %v1641_v36, 0.0  ;;  %v2981_v36 = vclamps-f32 %v802_v59, 10.0  ;;  %v1711_v59 = vsel %vm799_vm3, %v1633_v17, 0.0  ;;  %v2988_v17 = vclamps-f32 %v3994_v11, 10.0 }
 0x29f   :  { %1664 = vrot.lane.b32.xlu1 %v4029_v5, %s3537_s14  ;;  %1724 = vadd.xlane.f32.xlu0 %v1723_v45  ;;  %v860_v45 = vsel %vm799_vm3, %v3934_v53, 0.0  ;;  %v928_v53 = vmul.f32 1.442695, %v2985_v29 }
 0x2a0   :  { %v934_v43 = vmul.f32 1.442695, %v2988_v17 }
 0x2a1   :  { %v1639_v62 = vpop.permute.xlu1 %1638 }
 0x2a2   :  { %v1720_v34 = vsel %vm799_vm3, %v1639_v62, 0.0  ;;  %v2983_v62 = vclamps-f32 %v3985_v33, 10.0  ;;  %v2987_v33 = vclamps-f32 %v3997_v13, 10.0 }
 0x2a3   :  { %1721 = vadd.xlane.f32.xlu0 %v1720_v34  ;;  %v2982_v34 = vclamps-f32 %v3969_v44, 10.0  ;;  %v926_v44 = vmul.f32 1.442695, %v2984_v27 }
 0x2a4   :  { %v924_v18 = vmul.f32 1.442695, %v2983_v62  ;;  %v1714_v62 = vsel %vm799_vm3, %v4005_v9, 0.0 }
 0x2a5   :  { %v1645_v6 = vpop.permute.xlu1 %1644 }
 0x2a6   :  { %v1729_v24 = vsel %vm799_vm3, %v1645_v6, 0.0  ;;  %v920_v6 = vmul.f32 1.442695, %v2981_v36  ;;  %v993_v36 = vand.u32 127, %v145_v47 }
 0x2a7   :  { %1730 = vadd.xlane.f32.xlu0 %v1729_v24  ;;  %v863_v24 = vsel %vm799_vm3, %v796_v55, 0.0 }
 0x2a8   :  { %3246 = vpow2.f32 %v920_v6  ;;  %v4067_v6 = vsub.s32 %v993_v36, %v3732_v48 }
 0x2a9   :  { %3248 = vpow2.f32 %v924_v18 }
 0x2ab   :  { %1727 = vadd.xlane.f32.xlu0 %v1726_v35  ;;  %v922_v35 = vmul.f32 1.442695, %v2982_v34 }
 0x2ad   :  { %3250 = vpow2.f32 %v922_v35 }
 0x2ae   :  { %3252 = vpow2.f32 %v928_v53 }
 0x2af   :  { %3254 = vpow2.f32 %v926_v44 }
 0x2c3   :  { %843 = vadd.xlane.f32.xlu1 %v842_v37  ;;  %v2986_v37 = vclamps-f32 %v3987_v63, 10.0  ;;  %v4062_v63 = vpop.eup %3246 }
 0x2c4   :  { %v4064_v34 = vpop.eup %3248  ;;  %v997_v18 = vrot.slane %v4062_v63, %v4067_v6 }
 0x2c5   :  { %v930_v49 = vmul.f32 1.442695, %v2986_v37  ;;  %v4069_v11 = vpop.eup %3250  ;;  %v1005_v35 = vrot.slane %v4064_v34, %v4067_v6 }
 0x2c6   :  { %v4077_v27 = vpop.eup %3252 }
 0x2c7   :  { %846 = vadd.xlane.f32.xlu1 %v845_v22  ;;  %v932_v22 = vmul.f32 1.442695, %v2987_v33  ;;  %v4081_v53 = vpop.eup %3254  ;;  %v1013_v37 = vrot.slane %v4077_v27, %v4067_v6 }
 0x2c9   :  { %3256 = vpow2.f32 %v932_v22 }
 0x2ca   :  { %3258 = vpow2.f32 %v930_v49  ;;  %v1009_v49 = vrot.slane %v4081_v53, %v4067_v6 }
 0x2cb   :  { %861 = vadd.xlane.f32.xlu1 %v860_v45  ;;  %v1649_v45 = vpop.permute.xlu0 %1648  ;;  %3260 = vpow2.f32 %v934_v43 }
 0x2cf   :  { %864 = vadd.xlane.f32.xlu1 %v863_v24  ;;  %v1735_v24 = vsel %vm799_vm3, %v1649_v45, 0.0  ;;  %v1647_v9 = vpop.permute.xlu0 %1646 }
 0x2d0   :  { %v1732_v33 = vsel %vm799_vm3, %v1647_v9, 0.0  ;;  %v866_v9 = vsel %vm799_vm3, %v3972_v30, 0.0 }
 0x2d3   :  { %1712 = vadd.xlane.f32.xlu1 %v1711_v59  ;;  %v1001_v59 = vrot.slane %v4069_v11, %v4067_v6  ;;  %v4088_v22 = vpop.eup %3256  ;;  %v1651_v17 = vpop.permute.xlu0 %1650 }
 0x2d4   :  { %v4092_v36 = vpop.eup %3258  ;;  %v1738_v45 = vsel %vm799_vm3, %v1651_v17, 0.0  ;;  %v1021_v43 = vrot.slane %v4088_v22, %v4067_v6  ;;  %v3538_v17 = vmov 0  }
 0x2d5   :  { %v1091_v44 = vsel %vm1090_vm4, %v1001_v59, %v997_v18  ;;  %v4101_v18 = vpop.eup %3260  ;;  %3244 = vset.pattern.permute.xlu1 %v3538_v17  ;;  %3245 = vset.pattern.permute.xlu0 %v3538_v17 }
 0x2d6   :  { %v4053_v55 = vpop.xlane.xlu1 %840  ;;  %v1025_v59 = vrot.slane %v4101_v18, %v4067_v6 }
 0x2d7   :  { %1709 = vadd.xlane.f32.xlu1 %v1708_v40  ;;  %v1093_v40 = vsel %vm1092_vm5, %v1005_v35, %v1091_v44  ;;  %v4113_v30 = vpop.xlane.xlu0 %849  ;;  %v2994_v0 = vclamps-f32 %v4053_v55, 10.0 }
 0x2da   :  { %v4058_v13 = vpop.xlane.xlu1 %837 }
 0x2db   :  { %1715 = vadd.xlane.f32.xlu1 %v1714_v62  ;;  %v1095_v62 = vsel %vm1094_vm6, %v1009_v49, %v1093_v40  ;;  %v1659_v49 = vpop.permute.xlu0 %1658 }
 0x2de   :  { %v1653_v47 = vpop.permute.xlu1 %1652 }
 0x2df   :  { %1736 = vadd.xlane.f32.xlu1 %v1735_v24  ;;  %v1741_v29 = vsel %vm799_vm3, %v1653_v47, 0.0  ;;  %v1097_v47 = vsel %vm1096_vm7, %v1013_v37, %v1095_v62  ;;  %v1017_v24 = vrot.slane %v4092_v36, %v4067_v6 }
 0x2e0   :  { %1742 = vadd.xlane.f32.xlu0 %v1741_v29 }
 0x2e1   :  { %v1099_v29 = vsel %vm1098_vm8, %v1017_v24, %v1097_v47 }
 0x2e2   :  { %v1101_v35 = vsel %vm1100_vm9, %v1021_v43, %v1099_v29  ;;  %v4118_v43 = vpop.xlane.xlu0 %855 }
 0x2e3   :  { %1733 = vadd.xlane.f32.xlu1 %v1732_v33  ;;  %v869_v33 = vsel %vm799_vm3, %v4029_v5, 0.0  ;;  %v1103_v44 = vsel %vm1102_vm10, %v1025_v59, %v1101_v35  ;;  %v1750_v35 = vsel %vm799_vm3, %v1659_v49, 0.0 }
 0x2e4   :  { %v1122_v37 = vsel %vm1121_vm11, %v1103_v44, 0.0 }
 0x2e6   :  { %v4121_v24 = vpop.xlane.xlu0 %858 }
 0x2e7   :  { %1739 = vadd.xlane.f32.xlu1 %v1738_v45 }
 0x2ea   :  { %v1663_v59 = vpop.permute.xlu0 %1662 }
 0x2eb   :  { %867 = vadd.xlane.f32.xlu1 %v866_v9 }
 0x2ef   :  { %870 = vadd.xlane.f32.xlu1 %v869_v33  ;;  %v1756_v33 = vsel %vm799_vm3, %v1663_v59, 0.0  ;;  %v2993_v59 = vclamps-f32 %v4058_v13, 10.0 }
 0x2f1   :  { %v944_v19 = vmul.f32 1.442695, %v2993_v59 }
 0x2f3   :  { %1123 = vadd.xlane.f32.xlu1 %v1122_v37 }
 0x300   :  { %v1695_v17 = vpop.xlane.xlu0 %1694 }
 0x30f   :  { %v4115_v40 = vpop.xlane.xlu1 %852 }
 0x313   :  { %v1657_v45 = vpop.permute.xlu1 %1656 }
 0x314   :  { %v1747_v62 = vsel %vm799_vm3, %v1657_v45, 0.0  ;;  %v1692_v45 = vpop.xlane.xlu0 %1691 }
 0x315   :  { %1748 = vadd.xlane.f32.xlu0 %v1747_v62 }
 0x317   :  { %v1655_v5 = vpop.permute.xlu1 %1654 }
 0x318   :  { %v1744_v47 = vsel %vm799_vm3, %v1655_v5, 0.0  ;;  %v1701_v62 = vpop.xlane.xlu0 %1700 }
 0x319   :  { %1745 = vadd.xlane.f32.xlu0 %v1744_v47  ;;  %v2990_v47 = vclamps-f32 %v4021_v32, 10.0 }
 0x31b   :  { %v1661_v9 = vpop.permute.xlu1 %1660  ;;  %v938_v49 = vmul.f32 1.442695, %v2990_v47 }
 0x31c   :  { %v1753_v29 = vsel %vm799_vm3, %v1661_v9, 0.0  ;;  %v1698_v5 = vpop.xlane.xlu0 %1697  ;;  %v2989_v9 = vclamps-f32 %v4014_v14, 10.0  ;;  %v946_v14 = vmul.f32 1.442695, %v2994_v0 }
 0x31d   :  { %1754 = vadd.xlane.f32.xlu0 %v1753_v29  ;;  %v2991_v29 = vclamps-f32 %v4035_v41, 10.0  ;;  %3262 = vpow2.f32 %v938_v49  ;;  %v3007_v59 = vclamps-f32 %v1698_v5, 10.0 }
 0x31f   :  { %v1665_v44 = vpop.permute.xlu1 %1664 }
 0x320   :  { %v1759_v37 = vsel %vm799_vm3, %v1665_v44, 0.0  ;;  %v4128_v1 = vpop.xlane.xlu0 %1706  ;;  %v2992_v44 = vclamps-f32 %v4026_v15, 10.0  ;;  %v3006_v15 = vclamps-f32 %v1695_v17, 10.0 }
 0x321   :  { %1751 = vadd.xlane.f32.xlu0 %v1750_v35  ;;  %v936_v35 = vmul.f32 1.442695, %v2989_v9 }
 0x322   :  { %v942_v32 = vmul.f32 1.442695, %v2992_v44 }
 0x323   :  { %3264 = vpow2.f32 %v936_v35 }
 0x325   :  { %1757 = vadd.xlane.f32.xlu0 %v1756_v33  ;;  %v1704_v33 = vpop.xlane.xlu0 %1703 }
 0x326   :  { %v3009_v58 = vclamps-f32 %v1704_v33, 10.0 }
 0x327   :  { %v4139_v13 = vpop.eup %3262 }
 0x328   :  { %v1033_v0 = vrot.slane %v4139_v13, %v4067_v6 }
 0x329   :  { %1760 = vadd.xlane.f32.xlu0 %v1759_v37  ;;  %v940_v37 = vmul.f32 1.442695, %v2991_v29  ;;  %v4135_v2 = vpop.xlane.xlu0 %1718  ;;  %v3005_v29 = vclamps-f32 %v1692_v45, 10.0  ;;  %v1814_v45 = vmul.f32 1.442695, %v3007_v59 }
 0x32a   :  { %v3014_v61 = vclamps-f32 %v4135_v2, 10.0 }
 0x32b   :  { %3266 = vpow2.f32 %v940_v37  ;;  %v1810_v17 = vmul.f32 1.442695, %v3005_v29  ;;  %v1818_v29 = vmul.f32 1.442695, %v3009_v58 }
 0x32c   :  { %3268 = vpow2.f32 %v944_v19  ;;  %v1812_v19 = vmul.f32 1.442695, %v3006_v15  ;;  %v1828_v25 = vmul.f32 1.442695, %v3014_v61 }
 0x32d   :  { %3270 = vpow2.f32 %v942_v32  ;;  %v4137_v9 = vpop.xlane.xlu0 %1724  ;;  %v4141_v55 = vpop.eup %3264 }
 0x32e   :  { %3272 = vpow2.f32 %v946_v14  ;;  %v3016_v52 = vclamps-f32 %v4137_v9, 10.0 }
 0x335   :  { %v4145_v32 = vpop.eup %3266 }
 0x336   :  { %v4151_v5 = vpop.eup %3268  ;;  %v1037_v15 = vrot.slane %v4145_v32, %v4067_v6 }
 0x337   :  { %v4154_v46 = vpop.eup %3270  ;;  %v1045_v33 = vrot.slane %v4151_v5, %v4067_v6 }
 0x350   :  { %v844_v47 = vpop.xlane.xlu1 %843 }
 0x351   :  { %v2995_v41 = vclamps-f32 %v844_v47, 10.0  ;;  %v1029_v47 = vrot.slane %v4141_v55, %v4067_v6 }
 0x353   :  { %v948_v49 = vmul.f32 1.442695, %v2995_v41  ;;  %v1722_v41 = vpop.xlane.xlu0 %1721 }
 0x354   :  { %v847_v35 = vpop.xlane.xlu1 %846  ;;  %v3015_v16 = vclamps-f32 %v1722_v41, 10.0 }
 0x355   :  { %3274 = vpow2.f32 %v948_v49  ;;  %v2996_v44 = vclamps-f32 %v847_v35, 10.0  ;;  %v3008_v49 = vclamps-f32 %v1701_v62, 10.0  ;;  %v1104_v35 = vsel %vm1090_vm4, %v1033_v0, %v1029_v47 }
 0x356   :  { %v1105_v59 = vsel %vm1092_vm5, %v1037_v15, %v1104_v35  ;;  %v1041_v62 = vrot.slane %v4154_v46, %v4067_v6  ;;  %v3010_v47 = vclamps-f32 %v4128_v1, 10.0  ;;  %v1830_v54 = vmul.f32 1.442695, %v3015_v16 }
 0x357   :  { %v950_v37 = vmul.f32 1.442695, %v2996_v44  ;;  %v1816_v0 = vmul.f32 1.442695, %v3008_v49  ;;  %v1731_v12 = vpop.xlane.xlu0 %1730  ;;  %v2998_v16 = vclamps-f32 %v4115_v40, 10.0 }
 0x358   :  { %v4149_v14 = vpop.xlane.xlu1 %861  ;;  %v1820_v15 = vmul.f32 1.442695, %v3010_v47 }
 0x359   :  { %3276 = vpow2.f32 %v950_v37  ;;  %v4163_v37 = vpop.eup %3272 }
 0x35a   :  { %3278 = vpow2.f32 %v1812_v19  ;;  %v1049_v1 = vrot.slane %v4163_v37, %v4067_v6 }
 0x35b   :  { %3280 = vpow2.f32 %v1810_v17 }
 0x35c   :  { %v4158_v44 = vpop.xlane.xlu1 %864  ;;  %3282 = vpow2.f32 %v1814_v45  ;;  %v1106_v45 = vsel %vm1094_vm6, %v1041_v62, %v1105_v59  ;;  %v1728_v59 = vpop.xlane.xlu0 %1727 }
 0x35d   :  { %3284 = vpow2.f32 %v1818_v29  ;;  %v1107_v35 = vsel %vm1096_vm7, %v1045_v33, %v1106_v45  ;;  %v3017_v38 = vclamps-f32 %v1728_v59, 10.0  ;;  %v3018_v59 = vclamps-f32 %v1731_v12, 10.0 }
 0x35e   :  { %3286 = vpow2.f32 %v1816_v0  ;;  %v1108_v33 = vsel %vm1098_vm8, %v1049_v1, %v1107_v35  ;;  %v2997_v1 = vclamps-f32 %v4113_v30, 10.0 }
 0x35f   :  { %v4168_v19 = vpop.eup %3274  ;;  %3288 = vpow2.f32 %v1820_v15 }
 0x360   :  { %v1713_v17 = vpop.xlane.xlu1 %1712  ;;  %v1053_v60 = vrot.slane %v4168_v19, %v4067_v6 }
 0x361   :  { %v3012_v58 = vclamps-f32 %v1713_v17, 10.0 }
 0x362   :  { %v1109_v2 = vsel %vm1100_vm9, %v1053_v60, %v1108_v33 }
 0x363   :  { %v4177_v49 = vpop.eup %3276  ;;  %v1824_v29 = vmul.f32 1.442695, %v3012_v58  ;;  %v1832_v58 = vmul.f32 1.442695, %v3016_v52 }
 0x364   :  { %v1710_v62 = vpop.xlane.xlu1 %1709  ;;  %v1057_v17 = vrot.slane %v4177_v49, %v4067_v6  ;;  %v4183_v0 = vpop.eup %3278 }
 0x365   :  { %v3011_v47 = vclamps-f32 %v1710_v62, 10.0  ;;  %v4186_v45 = vpop.eup %3280  ;;  %3290 = vpow2.f32 %v1824_v29  ;;  %v1889_v15 = vrot.slane %v4183_v0, %v4067_v6 }
 0x366   :  { %v1110_v9 = vsel %vm1102_vm10, %v1057_v17, %v1109_v2  ;;  %v4189_v41 = vpop.eup %3282  ;;  %v1885_v60 = vrot.slane %v4186_v45, %v4067_v6  ;;  %v952_v17 = vmul.f32 1.442695, %v2997_v1  ;;  %v1836_v2 = vmul.f32 1.442695, %v3018_v59 }
 0x367   :  { %v1822_v21 = vmul.f32 1.442695, %v3011_v47  ;;  %v1125_v23 = vsel %vm1121_vm11, %v1110_v9, 0.0  ;;  %v1893_v52 = vrot.slane %v4189_v41, %v4067_v6  ;;  %v4199_v62 = vpop.eup %3284  ;;  %v3000_v1 = vclamps-f32 %v4121_v24, 10.0 }
 0x368   :  { %v1716_v35 = vpop.xlane.xlu1 %1715  ;;  %1126 = vadd.xlane.f32.xlu1 %v1125_v23  ;;  %v1834_v23 = vmul.f32 1.442695, %v3017_v38  ;;  %v4202_v29 = vpop.eup %3286  ;;  %v1978_v47 = vsel %vm1090_vm4, %v1889_v15, %v1885_v60  ;;  %v1901_v12 = vrot.slane %v4199_v62, %v4067_v6  ;;  %v954_v38 = vmul.f32 1.442695, %v2998_v16 }
 0x369   :  { %3292 = vpow2.f32 %v1822_v21  ;;  %v3013_v61 = vclamps-f32 %v1716_v35, 10.0  ;;  %v1897_v40 = vrot.slane %v4202_v29, %v4067_v6  ;;  %v4210_v9 = vpop.eup %3288 }
 0x36a   :  { %3294 = vpow2.f32 %v1828_v25  ;;  %v1979_v25 = vsel %vm1092_vm5, %v1893_v52, %v1978_v47  ;;  %v3001_v52 = vclamps-f32 %v4149_v14, 10.0  ;;  %v958_v47 = vmul.f32 1.442695, %v3000_v1 }
 0x36b   :  { %3296 = vpow2.f32 %v1832_v58  ;;  %v1826_v30 = vmul.f32 1.442695, %v3013_v61  ;;  %v1980_v61 = vsel %vm1094_vm6, %v1897_v40, %v1979_v25 }
 0x36c   :  { %3298 = vpow2.f32 %v1830_v54  ;;  %v1737_v21 = vpop.xlane.xlu1 %1736  ;;  %v2999_v54 = vclamps-f32 %v4118_v43, 10.0  ;;  %v1981_v59 = vsel %vm1096_vm7, %v1901_v12, %v1980_v61  ;;  %v3002_v43 = vclamps-f32 %v4158_v44, 10.0 }
 0x36d   :  { %3300 = vpow2.f32 %v1826_v30  ;;  %v3020_v33 = vclamps-f32 %v1737_v21, 10.0  ;;  %v1905_v30 = vrot.slane %v4210_v9, %v4067_v6  ;;  %v960_v25 = vmul.f32 1.442695, %v3001_v52 }
 0x36e   :  { %3302 = vpow2.f32 %v1834_v23  ;;  %v956_v21 = vmul.f32 1.442695, %v2999_v54  ;;  %v962_v54 = vmul.f32 1.442695, %v3002_v43 }
 0x36f   :  { %v1840_v58 = vmul.f32 1.442695, %v3020_v33  ;;  %3304 = vpow2.f32 %v952_v17  ;;  %v4215_v15 = vpop.eup %3290 }
 0x370   :  { %v1734_v35 = vpop.xlane.xlu1 %1733  ;;  %3306 = vpow2.f32 %v1836_v2  ;;  %v1913_v44 = vrot.slane %v4215_v15, %v4067_v6  ;;  %v1982_v2 = vsel %vm1098_vm8, %v1905_v30, %v1981_v59 }
 0x371   :  { %v3019_v60 = vclamps-f32 %v1734_v35, 10.0  ;;  %3308 = vpow2.f32 %v954_v38 }
 0x372   :  { %3310 = vpow2.f32 %v1840_v58 }
 0x373   :  { %v4219_v16 = vpop.eup %3292  ;;  %v1838_v23 = vmul.f32 1.442695, %v3019_v60 }
 0x374   :  { %v4224_v24 = vpop.eup %3294  ;;  %v4226_v17 = vpop.xlane.xlu1 %1739  ;;  %v1909_v14 = vrot.slane %v4219_v16, %v4067_v6 }
 0x375   :  { %v4230_v33 = vpop.eup %3296  ;;  %3312 = vpow2.f32 %v1838_v23  ;;  %v1921_v35 = vrot.slane %v4224_v24, %v4067_v6 }
 0x376   :  { %v4235_v12 = vpop.eup %3298  ;;  %v1983_v40 = vsel %vm1100_vm9, %v1909_v14, %v1982_v2  ;;  %3314 = vpow2.f32 %v956_v21  ;;  %v1929_v43 = vrot.slane %v4230_v33, %v4067_v6 }
 0x377   :  { %v4238_v38 = vpop.eup %3300  ;;  %v1984_v58 = vsel %vm1102_vm10, %v1913_v44, %v1983_v40  ;;  %3316 = vpow2.f32 %v958_v47  ;;  %v1925_v52 = vrot.slane %v4235_v12, %v4067_v6 }
 0x378   :  { %v1917_v1 = vrot.slane %v4238_v38, %v4067_v6  ;;  %v868_v60 = vpop.xlane.xlu1 %867  ;;  %v2002_v61 = vsel %vm1121_vm11, %v1984_v58, 0.0  ;;  %v4246_v59 = vpop.eup %3302  ;;  %3318 = vpow2.f32 %v960_v25 }
 0x379   :  { %4868 = vst [vmem:[#allocation42_spill] sm:$0xff] %v4246_v59  ;;  %v3003_v23 = vclamps-f32 %v868_v60, 10.0  ;;  %2003 = vadd.xlane.f32.xlu0 %v2002_v61  ;;  %v4253_v21 = vpop.eup %3304  ;;  %3320 = vpow2.f32 %v962_v54  ;;  %v1933_v47 = vrot.slane %v4246_v59, %v4067_v6 }
 0x37a   :  { %v1985_v30 = vsel %vm1090_vm4, %v1921_v35, %v1917_v1  ;;  %v4256_v2 = vpop.eup %3306 }
 0x37b   :  { %v964_v14 = vmul.f32 1.442695, %v3003_v23  ;;  %v1986_v44 = vsel %vm1092_vm5, %v1925_v52, %v1985_v30  ;;  %4869 = vst [vmem:[#allocation43_spill] sm:$0xff] %v4256_v2  ;;  %v4261_v60 = vpop.eup %3308  ;;  %v1937_v52 = vrot.slane %v4256_v2, %v4067_v6 }
 0x37c   :  { %v871_v40 = vpop.xlane.xlu1 %870  ;;  %v1987_v58 = vsel %vm1094_vm6, %v1929_v43, %v1986_v44  ;;  %v4263_v61 = vpop.eup %3310  ;;  %v1065_v23 = vrot.slane %v4261_v60, %v4067_v6 }
 0x37d   :  { %3322 = vpow2.f32 %v964_v14  ;;  %v3004_v25 = vclamps-f32 %v871_v40, 10.0  ;;  %v1988_v35 = vsel %vm1096_vm7, %v1933_v47, %v1987_v58  ;;  %v1945_v30 = vrot.slane %v4263_v61, %v4067_v6 }
 0x37e   :  { %v1989_v14 = vsel %vm1098_vm8, %v1937_v52, %v1988_v35  ;;  %v1061_v47 = vrot.slane %v4253_v21, %v4067_v6 }
 0x37f   :  { %v4266_v54 = vpop.eup %3312  ;;  %v966_v1 = vmul.f32 1.442695, %v3004_v25 }
 0x380   :  { %v1941_v43 = vrot.slane %v4266_v54, %v4067_v6  ;;  %v4277_v44 = vpop.eup %3314  ;;  %v1111_v3 = vsel %vm1090_vm4, %v1065_v23, %v1061_v47 }
 0x381   :  { %3324 = vpow2.f32 %v966_v1  ;;  %v4282_v58 = vpop.eup %3316  ;;  %v1069_v35 = vrot.slane %v4277_v44, %v4067_v6 }
 0x382   :  { %v1990_v40 = vsel %vm1100_vm9, %v1941_v43, %v1989_v14  ;;  %v4285_v28 = vpop.eup %3318 }
 0x383   :  { %v1991_v25 = vsel %vm1102_vm10, %v1945_v30, %v1990_v40  ;;  %v4289_v42 = vpop.eup %3320  ;;  %v1077_v43 = vrot.slane %v4285_v28, %v4067_v6  ;;  %v1112_v14 = vsel %vm1092_vm5, %v1069_v35, %v1111_v3  ;;  %v1073_v30 = vrot.slane %v4282_v58, %v4067_v6 }
 0x384   :  { %v2005_v1 = vsel %vm1121_vm11, %v1991_v25, 0.0  ;;  %v1081_v40 = vrot.slane %v4289_v42, %v4067_v6 }
 0x385   :  { %2006 = vadd.xlane.f32.xlu0 %v2005_v1  ;;  %v1113_v47 = vsel %vm1094_vm6, %v1073_v30, %v1112_v14  ;;  %v1124_v1 = vpop.xlane.xlu1 %1123  ;;  %v1743_v30 = vpop.xlane.xlu0 %1742 }
 0x386   :  { %v1114_v39 = vsel %vm1096_vm7, %v1077_v43, %v1113_v47  ;;  %3326 = vrcp.f32 %v1124_v1  ;;  %v4319_v43 = vsub.s32 2, %v3732_v48  ;;  %v3021_v1 = vclamps-f32 %v4226_v17, 10.0 }
 0x387   :  { %v4293_v52 = vpop.eup %3322  ;;  %v1115_v3 = vsel %vm1098_vm8, %v1081_v40, %v1114_v39  ;;  %v4325_v40 = vsub.s32 3, %v3732_v48 }
 0x388   :  { %4870 = vst [vmem:[#allocation44_spill] sm:$0xff] %v4293_v52  ;;  %v1085_v23 = vrot.slane %v4293_v52, %v4067_v6 }
 0x38a   :  { %v1116_v35 = vsel %vm1100_vm9, %v1085_v23, %v1115_v3  ;;  %v4331_v23 = vsub.s32 4, %v3732_v48  ;;  %v3022_v3 = vclamps-f32 %v1743_v30, 10.0 }
 0x38b   :  { %v4305_v25 = vpop.eup %3324 }
 0x38c   :  { %4871 = vst [vmem:[#allocation45_spill] sm:$0xff] %v4305_v25  ;;  %v1089_v8 = vrot.slane %v4305_v25, %v4067_v6  ;;  %v1842_v25 = vmul.f32 1.442695, %v3021_v1  ;;  %v1844_v7 = vmul.f32 1.442695, %v3022_v3 }
 0x38e   :  { %v1117_v56 = vsel %vm1102_vm10, %v1089_v8, %v1116_v35  ;;  %3328 = vpow2.f32 %v1842_v25 }
 0x38f   :  { %v1128_v4 = vsel %vm1121_vm11, %v1117_v56, 0.0 }
 0x390   :  { %1129 = vadd.xlane.f32.xlu1 %v1128_v4  ;;  %v4314_v52 = vpop.eup %3326 }
 0x391   :  { %v1140_v14 = vrot.slane %v4314_v52, %v3745_v57  ;;  %v1148_v39 = vrot.slane %v4314_v52, %v4319_v43  ;;  %v1152_v8 = vrot.slane %v4314_v52, %v4325_v40 }
 0x393   :  { %v1257_v47 = vmul.f32 %v4062_v63, %v1140_v14  ;;  %v1259_v4 = vmul.f32 %v4064_v34, %v1148_v39  ;;  %v1260_v14 = vmul.f32 %v4081_v53, %v1152_v8 }
 0x398   :  { %v4338_v3 = vpop.eup %3328 }
 0x3a1   :  { %1283 = vperm.xlu1 %3244, %v1257_v47   ;;  %v1156_v47 = vrot.slane %v4314_v52, %v4331_v23 }
 0x3a2   :  { %v1749_v56 = vpop.xlane.xlu0 %1748 }
 0x3a3   :  { %v3024_v34 = vclamps-f32 %v1749_v56, 10.0  ;;  %v1261_v2 = vmul.f32 %v4077_v27, %v1156_v47 }
 0x3a5   :  { %1293 = vperm.xlu1 %3244, %v1259_v4   ;;  %v1848_v17 = vmul.f32 1.442695, %v3024_v34 }
 0x3a6   :  { %v1746_v63 = vpop.xlane.xlu0 %1745 }
 0x3a7   :  { %v3023_v35 = vclamps-f32 %v1746_v63, 10.0 }
 0x3a9   :  { %1298 = vperm.xlu1 %3244, %v1260_v14   ;;  %v1846_v39 = vmul.f32 1.442695, %v3023_v35 }
 0x3aa   :  { %v1755_v20 = vpop.xlane.xlu0 %1754 }
 0x3ab   :  { %3330 = vpow2.f32 %v1846_v39  ;;  %v3026_v4 = vclamps-f32 %v1755_v20, 10.0 }
 0x3ac   :  { %3332 = vpow2.f32 %v1844_v7  ;;  %v1949_v7 = vrot.slane %v4338_v3, %v4067_v6 }
 0x3ad   :  { %1303 = vperm.xlu1 %3244, %v1261_v2   ;;  %3334 = vpow2.f32 %v1848_v17  ;;  %v1852_v8 = vmul.f32 1.442695, %v3026_v4 }
 0x3ae   :  { %v1752_v30 = vpop.xlane.xlu0 %1751 }
 0x3af   :  { %v3025_v63 = vclamps-f32 %v1752_v30, 10.0 }
 0x3b1   :  { %v1850_v53 = vmul.f32 1.442695, %v3025_v63 }
 0x3b2   :  { %v1758_v59 = vpop.xlane.xlu0 %1757 }
 0x3b3   :  { %3336 = vpow2.f32 %v1850_v53  ;;  %v3027_v1 = vclamps-f32 %v1758_v59, 10.0 }
 0x3b4   :  { %3338 = vpow2.f32 %v1852_v8 }
 0x3b5   :  { %v1854_v56 = vmul.f32 1.442695, %v3027_v1  ;;  %v4340_v2 = vpop.eup %3330 }
 0x3b6   :  { %v1761_v35 = vpop.xlane.xlu0 %1760  ;;  %v4342_v25 = vpop.eup %3332  ;;  %v1957_v14 = vrot.slane %v4340_v2, %v4067_v6 }
 0x3b7   :  { %3340 = vpow2.f32 %v1854_v56  ;;  %v3028_v27 = vclamps-f32 %v1761_v35, 10.0  ;;  %v4348_v59 = vpop.eup %3334  ;;  %v1953_v47 = vrot.slane %v4342_v25, %v4067_v6 }
 0x3b8   :  { %v1961_v63 = vrot.slane %v4348_v59, %v4067_v6 }
 0x3b9   :  { %v1856_v20 = vmul.f32 1.442695, %v3028_v27  ;;  %v1992_v39 = vsel %vm1090_vm4, %v1953_v47, %v1949_v7 }
 0x3ba   :  { %v1993_v4 = vsel %vm1092_vm5, %v1957_v14, %v1992_v39 }
 0x3bb   :  { %3342 = vpow2.f32 %v1856_v20  ;;  %v1994_v8 = vsel %vm1094_vm6, %v1961_v63, %v1993_v4  ;;  %v4381_v4 = vsub.s32 5, %v3732_v48 }
 0x3bd   :  { %v4352_v34 = vpop.eup %3336 }
 0x3be   :  { %v1965_v17 = vrot.slane %v4352_v34, %v4067_v6  ;;  %v4358_v30 = vpop.eup %3338 }
 0x3bf   :  { %v1969_v35 = vrot.slane %v4358_v30, %v4067_v6 }
 0x3c0   :  { %v1995_v56 = vsel %vm1096_vm7, %v1965_v17, %v1994_v8  ;;  %v1144_v17 = vrot.slane %v4314_v52, %v3735_v51  ;;  %v1160_v8 = vrot.slane %v4314_v52, %v4381_v4 }
 0x3c1   :  { %v4362_v53 = vpop.eup %3340  ;;  %v1996_v7 = vsel %vm1098_vm8, %v1969_v35, %v1995_v56  ;;  %v4387_v56 = vsub.s32 6, %v3732_v48 }
 0x3c2   :  { %v1973_v1 = vrot.slane %v4362_v53, %v4067_v6  ;;  %v1258_v63 = vmul.f32 %v4069_v11, %v1144_v17 }
 0x3c3   :  { %v1164_v35 = vrot.slane %v4314_v52, %v4387_v56 }
 0x3c4   :  { %v1997_v14 = vsel %vm1100_vm9, %v1973_v1, %v1996_v7  ;;  %v1262_v1 = vmul.f32 %v4092_v36, %v1160_v8 }
 0x3c5   :  { %v4370_v27 = vpop.eup %3342  ;;  %v1263_v7 = vmul.f32 %v4088_v22, %v1164_v35 }
 0x3c6   :  { %v1977_v20 = vrot.slane %v4370_v27, %v4067_v6 }
 0x3c8   :  { %v1998_v47 = vsel %vm1102_vm10, %v1977_v20, %v1997_v14  ;;  %v4393_v20 = vsub.s32 7, %v3732_v48 }
 0x3c9   :  { %v2008_v39 = vsel %vm1121_vm11, %v1998_v47, 0.0 }
 0x3ca   :  { %2009 = vadd.xlane.f32.xlu0 %v2008_v39  ;;  %v1168_v11 = vrot.slane %v4314_v52, %v4393_v20 }
 0x3cc   :  { %v1264_v14 = vmul.f32 %v4101_v18, %v1168_v11 }
 0x3e0   :  { %1288 = vperm.xlu0 %3245, %v1258_v63  }
 0x3e4   :  { %1308 = vperm.xlu0 %3245, %v1262_v1  }
 0x3e8   :  { %1313 = vperm.xlu0 %3245, %v1263_v7  }
 0x3ec   :  { %1318 = vperm.xlu0 %3245, %v1264_v14  }
 0x3f5   :  { %v1127_v47 = vpop.xlane.xlu1 %1126 }
 0x3f6   :  { %3344 = vrcp.f32 %v1127_v47 }
 0x400   :  { %v3345_v39 = vpop.eup %3344 }
 0x401   :  { %v1172_v36 = vrot.slane %v3345_v39, %v3745_v57  ;;  %v1176_v17 = vrot.slane %v3345_v39, %v3735_v51  ;;  %v1180_v22 = vrot.slane %v3345_v39, %v4319_v43  ;;  %v1188_v8 = vrot.slane %v3345_v39, %v4331_v23 }
 0x402   :  { %v1184_v1 = vrot.slane %v3345_v39, %v4325_v40  ;;  %v1192_v35 = vrot.slane %v3345_v39, %v4381_v4  ;;  %v1196_v7 = vrot.slane %v3345_v39, %v4387_v56 }
 0x403   :  { %v1265_v48 = vmul.f32 %v4141_v55, %v1172_v36  ;;  %v1266_v63 = vmul.f32 %v4139_v13, %v1176_v17  ;;  %v1267_v18 = vmul.f32 %v4145_v32, %v1180_v22  ;;  %v1269_v52 = vmul.f32 %v4151_v5, %v1188_v8 }
 0x404   :  { %v1268_v55 = vmul.f32 %v4154_v46, %v1184_v1  ;;  %v1270_v13 = vmul.f32 %v4163_v37, %v1192_v35  ;;  %v1271_v11 = vmul.f32 %v4168_v19, %v1196_v7  ;;  %v1200_v32 = vrot.slane %v3345_v39, %v4393_v20 }
 0x405   :  { %1323 = vperm.xlu1 %3244, %v1265_v48   ;;  %1328 = vperm.xlu0 %3245, %v1266_v63  }
 0x406   :  { %v1272_v5 = vmul.f32 %v4177_v49, %v1200_v32  ;;  %v2004_v47 = vpop.xlane.xlu0 %2003 }
 0x409   :  { %1333 = vperm.xlu1 %3244, %v1267_v18   ;;  %1343 = vperm.xlu0 %3245, %v1269_v52  }
 0x40d   :  { %1338 = vperm.xlu1 %3244, %v1268_v55   ;;  %1348 = vperm.xlu0 %3245, %v1270_v13  }
 0x411   :  { %1353 = vperm.xlu0 %3245, %v1271_v11  }
 0x412   :  { %v2007_v17 = vpop.xlane.xlu0 %2006 }
 0x415   :  { %1358 = vperm.xlu0 %3245, %v1272_v5  }
 0x41d   :  { %v1130_v14 = vpop.xlane.xlu1 %1129 }
 0x41e   :  { %3346 = vrcp.f32 %v1130_v14 }
 0x41f   :  { %3348 = vrcp.f32 %v2004_v47 }
 0x420   :  { %3350 = vrcp.f32 %v2007_v17 }
 0x428   :  { %v4415_v36 = vpop.eup %3346 }
 0x429   :  { %v1204_v46 = vrot.slane %v4415_v36, %v3745_v57  ;;  %v1208_v37 = vrot.slane %v4415_v36, %v3735_v51  ;;  %v1212_v49 = vrot.slane %v4415_v36, %v4319_v43  ;;  %v1220_v48 = vrot.slane %v4415_v36, %v4331_v23 }
 0x42a   :  { %v1216_v8 = vrot.slane %v4415_v36, %v4325_v40 }
 0x42b   :  { %v1273_v19 = vmul.f32 %v4253_v21, %v1204_v46  ;;  %v1274_v39 = vmul.f32 %v4261_v60, %v1208_v37  ;;  %v1275_v63 = vmul.f32 %v4277_v44, %v1212_v49  ;;  %v1277_v22 = vmul.f32 %v4285_v28, %v1220_v48  ;;  %v3349_v60 = vpop.eup %3348  ;;  %v1284_v37 = vpop.permute.xlu1 %1283 }
 0x42c   :  { %v1224_v21 = vrot.slane %v4415_v36, %v4381_v4  ;;  %v1276_v18 = vmul.f32 %v4282_v58, %v1216_v8  ;;  %v2044_v1 = vrot.slane %v3349_v60, %v4387_v56  ;;  %v2020_v35 = vrot.slane %v3349_v60, %v3745_v57  ;;  %v4441_v7 = vpop.eup %3350 }
 0x42d   :  { %1363 = vperm.xlu1 %3244, %v1273_v19   ;;  %1368 = vperm.xlu0 %3245, %v1274_v39   ;;  %v2048_v55 = vrot.slane %v3349_v60, %v4393_v20  ;;  %v2024_v13 = vrot.slane %v3349_v60, %v3735_v51  ;;  %v2028_v11 = vrot.slane %v3349_v60, %v4319_v43 }
 0x42e   :  { %v1278_v52 = vmul.f32 %v4289_v42, %v1224_v21  ;;  %v2143_v28 = vmul.f32 %v4219_v16, %v2044_v1  ;;  %v2137_v44 = vmul.f32 %v4186_v45, %v2020_v35  ;;  %v2052_v32 = vrot.slane %v4441_v7, %v3745_v57 }
 0x42f   :  { %v2144_v42 = vmul.f32 %v4215_v15, %v2048_v55  ;;  %v2138_v58 = vmul.f32 %v4183_v0, %v2024_v13  ;;  %v2139_v45 = vmul.f32 %v4189_v41, %v2028_v11  ;;  %v2032_v5 = vrot.slane %v3349_v60, %v4325_v40  ;;  %v1294_v19 = vpop.permute.xlu1 %1293  ;;  %v4872_v55 = vld [vmem:[#allocation42_spill] sm:$0xff] }
 0x430   :  { %v2145_v16 = vmul.f32 %v4238_v38, %v2052_v32  ;;  %v2076_v14 = vrot.slane %v4441_v7, %v4387_v56  ;;  %v2036_v47 = vrot.slane %v3349_v60, %v4331_v23  ;;  %v2080_v46 = vrot.slane %v4441_v7, %v4393_v20 }
 0x431   :  { %1373 = vperm.xlu1 %3244, %v1275_v63   ;;  %1383 = vperm.xlu0 %3245, %v1277_v22   ;;  %v2140_v0 = vmul.f32 %v4202_v29, %v2032_v5  ;;  %v2040_v17 = vrot.slane %v3349_v60, %v4381_v4  ;;  %v1401_v39 = vmul.f32 %v1284_v37, %v3763_v10 }
 0x432   :  { %v2151_v15 = vmul.f32 %v4266_v54, %v2076_v14  ;;  %v2141_v41 = vmul.f32 %v4199_v62, %v2036_v47  ;;  %v2152_v38 = vmul.f32 %v4263_v61, %v2080_v46  ;;  %v2056_v54 = vrot.slane %v4441_v7, %v3735_v51 }
 0x433   :  { %v2142_v29 = vmul.f32 %v4210_v9, %v2040_v17  ;;  %v2060_v62 = vrot.slane %v4441_v7, %v4319_v43  ;;  %v1299_v61 = vpop.permute.xlu1 %1298  ;;  %v1426_v48 = vsel %vm1425_vm12, %v1401_v39, 0.0  ;;  %v1403_v63 = vmul.f32 %v1294_v19, %v3780_v31 }
 0x434   :  { %v2146_v49 = vmul.f32 %v4224_v24, %v2056_v54  ;;  %v2064_v22 = vrot.slane %v4441_v7, %v4325_v40  ;;  %v1404_v8 = vmul.f32 %v1299_v61, %v3776_v26  ;;  %v1427_v21 = vrot.slane %v1426_v48, 4 }
 0x435   :  { %1378 = vperm.xlu1 %3244, %v1276_v18   ;;  %1388 = vperm.xlu0 %3245, %v1278_v52   ;;  %v2147_v9 = vmul.f32 %v4235_v12, %v2060_v62  ;;  %v1440_v60 = vsel %vm1425_vm12, %v1403_v63, 0.0  ;;  %v2068_v1 = vrot.slane %v4441_v7, %v4331_v23  ;;  %v1228_v61 = vrot.slane %v4415_v36, %v4387_v56 }
 0x436   :  { %v2148_v52 = vmul.f32 %v4230_v33, %v2064_v22  ;;  %v1447_v35 = vsel %vm1425_vm12, %v1404_v8, 0.0 }
 0x437   :  { %v1304_v24 = vpop.permute.xlu1 %1303  ;;  %v2149_v13 = vmul.f32 %v4872_v55, %v2068_v1 }
 0x438   :  { %v1405_v12 = vmul.f32 %v1304_v24, %v3806_v50 }
 0x439   :  { %2193 = vperm.xlu0 %3245, %v2143_v28   ;;  %2163 = vperm.xlu1 %3244, %v2137_v44   ;;  %v1428_v28 = vadd.f32 %v1427_v21, %v1426_v48  ;;  %v1441_v44 = vrot.slane %v1440_v60, 4 }
 0x43a   :  { %v1454_v11 = vsel %vm1425_vm12, %v1405_v12, 0.0 }
 0x43b   :  { %v1429_v33 = vrot.slane %v1428_v28, 2  ;;  %v1442_v32 = vadd.f32 %v1441_v44, %v1440_v60 }
 0x43d   :  { %2198 = vperm.xlu0 %3245, %v2144_v42   ;;  %2168 = vperm.xlu1 %3244, %v2138_v58   ;;  %v2072_v42 = vrot.slane %v4441_v7, %v4381_v4  ;;  %v1448_v58 = vrot.slane %v1447_v35, 4  ;;  %v1430_v37 = vadd.f32 %v1429_v33, %v1428_v28 }
 0x43f   :  { %v1449_v14 = vadd.f32 %v1448_v58, %v1447_v35  ;;  %v1431_v8 = vrot.slane %v1430_v37, 1 }
 0x441   :  { %2173 = vperm.xlu1 %3244, %v2139_v45   ;;  %2203 = vperm.xlu0 %3245, %v2145_v16   ;;  %v4873_v16 = vld [vmem:[#allocation43_spill] sm:$0xff]  ;;  %v1450_v54 = vrot.slane %v1449_v14, 2 }
 0x442   :  { %v2150_v5 = vmul.f32 %v4873_v16, %v2072_v42  ;;  %v1432_v42 = vadd.f32 %v1431_v8, %v1430_v37  ;;  %v4878_v16 = vld [vmem:[#allocation45_spill] sm:$0xff] }
 0x445   :  { %2178 = vperm.xlu1 %3244, %v2140_v0   ;;  %2233 = vperm.xlu0 %3245, %v2151_v15   ;;  %v1455_v0 = vrot.slane %v1454_v11, 4  ;;  %v4874_v15 = vld [vmem:[#allocation21_spill] sm:$0xff] }
 0x447   :  { %v1456_v39 = vadd.f32 %v1455_v0, %v1454_v11 }
 0x449   :  { %2183 = vperm.xlu1 %3244, %v2141_v41   ;;  %2238 = vperm.xlu0 %3245, %v2152_v38   ;;  %v1443_v41 = vrot.slane %v1442_v32, 2  ;;  %v1457_v1 = vrot.slane %v1456_v39, 2 }
 0x44b   :  { %v1458_v0 = vadd.f32 %v1457_v1, %v1456_v39 }
 0x44d   :  { %2188 = vperm.xlu1 %3244, %v2142_v29  }
 0x451   :  { %2208 = vperm.xlu1 %3244, %v2146_v49   ;;  %v4875_v49 = vld [vmem:[#allocation26_spill] sm:$0xff] }
 0x455   :  { %2213 = vperm.xlu1 %3244, %v2147_v9  }
 0x457   :  { %v2010_v18 = vpop.xlane.xlu0 %2009 }
 0x458   :  { %3352 = vrcp.f32 %v2010_v18  ;;  %v1232_v18 = vrot.slane %v4415_v36, %v4393_v20 }
 0x459   :  { %2218 = vperm.xlu1 %3244, %v2148_v52   ;;  %v1451_v52 = vadd.f32 %v1450_v54, %v1449_v14 }
 0x45b   :  { %v1452_v14 = vrot.slane %v1451_v52, 1 }
 0x45d   :  { %2223 = vperm.xlu1 %3244, %v2149_v13   ;;  %v1453_v39 = vadd.f32 %v1452_v14, %v1451_v52 }
 0x45f   :  { %v1289_v45 = vpop.permute.xlu0 %1288 }
 0x460   :  { %v1402_v47 = vmul.f32 %v1289_v45, %v4874_v15 }
 0x461   :  { %2228 = vperm.xlu1 %3244, %v2150_v5   ;;  %v1280_v5 = vmul.f32 %v4878_v16, %v1232_v18 }
 0x462   :  { %v4486_v46 = vpop.eup %3352  ;;  %v1433_v7 = vsel %vm1425_vm12, %v1402_v47, 0.0  ;;  %v4879_v47 = vld [vmem:[#allocation23_spill] sm:$0xff] }
 0x463   :  { %v1434_v38 = vrot.slane %v1433_v7, 4  ;;  %v1309_v17 = vpop.permute.xlu0 %1308  ;;  %v2088_v19 = vrot.slane %v4486_v46, %v3735_v51  ;;  %v2084_v29 = vrot.slane %v4486_v46, %v3745_v57  ;;  %v2092_v22 = vrot.slane %v4486_v46, %v4319_v43 }
 0x464   :  { %v1406_v62 = vmul.f32 %v1309_v17, %v4875_v49  ;;  %v1444_v51 = vadd.f32 %v1443_v41, %v1442_v32  ;;  %v2096_v13 = vrot.slane %v4486_v46, %v4325_v40 }
 0x465   :  { %v1435_v48 = vadd.f32 %v1434_v38, %v1433_v7  ;;  %v2154_v63 = vmul.f32 %v4342_v25, %v2088_v19  ;;  %v2153_v9 = vmul.f32 %v4338_v3, %v2084_v29  ;;  %v4876_v25 = vld [vmem:[#allocation24_spill] sm:$0xff]  ;;  %v2155_v55 = vmul.f32 %v4340_v2, %v2092_v22 }
 0x466   :  { %v1461_v21 = vsel %vm1425_vm12, %v1406_v62, 0.0  ;;  %v4877_v3 = vld [vmem:[#allocation44_spill] sm:$0xff]  ;;  %v1445_v58 = vrot.slane %v1444_v51, 1  ;;  %v2100_v2 = vrot.slane %v4486_v46, %v4331_v23  ;;  %v2156_v17 = vmul.f32 %v4348_v59, %v2096_v13 }
 0x467   :  { %v1436_v57 = vrot.slane %v1435_v48, 2  ;;  %v1462_v24 = vrot.slane %v1461_v21, 4  ;;  %2248 = vperm.xlu1 %3244, %v2154_v63   ;;  %2243 = vperm.xlu0 %3245, %v2153_v9   ;;  %v1314_v60 = vpop.permute.xlu0 %1313  ;;  %v1279_v12 = vmul.f32 %v4877_v3, %v1228_v61  ;;  %v2104_v9 = vrot.slane %v4486_v46, %v4381_v4 }
 0x468   :  { %v1407_v35 = vmul.f32 %v1314_v60, %v4876_v25  ;;  %v1446_v19 = vadd.f32 %v1445_v58, %v1444_v51  ;;  %v2157_v59 = vmul.f32 %v4352_v34, %v2100_v2  ;;  %v2112_v13 = vrot.slane %v4486_v46, %v4393_v20  ;;  %v4883_v2 = vld [vmem:[#allocation29_spill] sm:$0xff] }
 0x469   :  { %v1437_v28 = vadd.f32 %v1436_v57, %v1435_v48  ;;  %v1463_v44 = vadd.f32 %v1462_v24, %v1461_v21  ;;  %v1459_v48 = vrot.slane %v1458_v0, 1  ;;  %v2158_v52 = vmul.f32 %v4358_v30, %v2104_v9  ;;  %v4885_v9 = vld [vmem:[#allocation35_spill] sm:$0xff] }
 0x46a   :  { %v1468_v11 = vsel %vm1425_vm12, %v1407_v35, 0.0  ;;  %v2108_v35 = vrot.slane %v4486_v46, %v4387_v56  ;;  %v2160_v56 = vmul.f32 %v4370_v27, %v2112_v13 }
 0x46b   :  { %v1438_v33 = vrot.slane %v1437_v28, 1  ;;  %v1464_v32 = vrot.slane %v1463_v44, 2  ;;  %v1469_v36 = vrot.slane %v1468_v11, 4  ;;  %2253 = vperm.xlu1 %3244, %v2155_v55   ;;  %1393 = vperm.xlu0 %3245, %v1279_v12   ;;  %v1319_v45 = vpop.permute.xlu0 %1318  ;;  %v1460_v60 = vadd.f32 %v1459_v48, %v1458_v0  ;;  %v4882_v0 = vld [vmem:[#allocation28_spill] sm:$0xff]  ;;  %v4884_v48 = vld [vmem:[#allocation27_spill] sm:$0xff] }
 0x46c   :  { %v1408_v41 = vmul.f32 %v1319_v45, %v4879_v47  ;;  %v2159_v34 = vmul.f32 %v4362_v53, %v2108_v35 }
 0x46d   :  { %v1439_v7 = vadd.f32 %v1438_v33, %v1437_v28  ;;  %v1465_v37 = vadd.f32 %v1464_v32, %v1463_v44  ;;  %v1470_v38 = vadd.f32 %v1469_v36, %v1468_v11  ;;  %v4880_v33 = vld [vmem:[#allocation25_spill] sm:$0xff] }
 0x46e   :  { %v1475_v29 = vsel %vm1425_vm12, %v1408_v41, 0.0  ;;  %v4881_v32 = vld [vmem:[#allocation33_spill] sm:$0xff] }
 0x46f   :  { %v2498_v54 = vsel %vm1090_vm4, %v1439_v7, %v1432_v42  ;;  %v1471_v62 = vrot.slane %v1470_v38, 2  ;;  %v1476_v61 = vrot.slane %v1475_v29, 4  ;;  %2258 = vperm.xlu1 %3244, %v2156_v17   ;;  %1398 = vperm.xlu0 %3245, %v1280_v5   ;;  %v1466_v22 = vrot.slane %v1465_v37, 1 }
 0x470   :  { %v2499_v63 = vsel %vm1092_vm5, %v1446_v19, %v2498_v54 }
 0x471   :  { %v1472_v8 = vadd.f32 %v1471_v62, %v1470_v38  ;;  %v1477_v21 = vadd.f32 %v1476_v61, %v1475_v29  ;;  %v2500_v24 = vsel %vm1094_vm6, %v1453_v39, %v2499_v63  ;;  %v1467_v18 = vadd.f32 %v1466_v22, %v1465_v37 }
 0x472   :  { %v2501_v12 = vsel %vm1096_vm7, %v1460_v60, %v2500_v24 }
 0x473   :  { %v1473_v51 = vrot.slane %v1472_v8, 1  ;;  %v1478_v57 = vrot.slane %v1477_v21, 2  ;;  %2263 = vperm.xlu1 %3244, %v2157_v59   ;;  %v2502_v55 = vsel %vm1098_vm8, %v1467_v18, %v2501_v12 }
 0x475   :  { %v1479_v1 = vadd.f32 %v1478_v57, %v1477_v21  ;;  %v1474_v3 = vadd.f32 %v1473_v51, %v1472_v8 }
 0x477   :  { %v1480_v28 = vrot.slane %v1479_v1, 1  ;;  %2268 = vperm.xlu1 %3244, %v2158_v52   ;;  %v2503_v42 = vsel %vm1100_vm9, %v1474_v3, %v2502_v55  ;;  %v4886_v3 = vld [vmem:[#allocation31_spill] sm:$0xff] }
 0x479   :  { %v1481_v44 = vadd.f32 %v1480_v28, %v1479_v1 }
 0x47b   :  { %2273 = vperm.xlu1 %3244, %v2159_v34   ;;  %v2504_v30 = vsel %vm1102_vm10, %v1481_v44, %v2503_v42 }
 0x47c   :  { %2519 = vrot.lane.b32.xlu0 %v2504_v30, %s3539_s0 }
 0x47f   :  { %2278 = vperm.xlu1 %3244, %v2160_v56  }
 0x484   :  { %v1324_v58 = vpop.permute.xlu1 %1323  ;;  %v1329_v11 = vpop.permute.xlu0 %1328 }
 0x485   :  { %v1409_v53 = vmul.f32 %v1324_v58, %v4880_v33  ;;  %v1410_v36 = vmul.f32 %v1329_v11, %v4881_v32 }
 0x487   :  { %v1482_v45 = vsel %vm1425_vm12, %v1409_v53, 0.0  ;;  %v1489_v20 = vsel %vm1425_vm12, %v1410_v36, 0.0 }
 0x488   :  { %v1483_v46 = vrot.slane %v1482_v45, 4  ;;  %v1490_v16 = vrot.slane %v1489_v20, 4  ;;  %v1334_v5 = vpop.permute.xlu1 %1333  ;;  %v1344_v14 = vpop.permute.xlu0 %1343 }
 0x489   :  { %v1411_v41 = vmul.f32 %v1334_v5, %v4882_v0  ;;  %v1413_v7 = vmul.f32 %v1344_v14, %v4883_v2 }
 0x48a   :  { %v1484_v27 = vadd.f32 %v1483_v46, %v1482_v45  ;;  %v1491_v37 = vadd.f32 %v1490_v16, %v1489_v20  ;;  %v4887_v45 = vld [vmem:[#allocation30_spill] sm:$0xff] }
 0x48b   :  { %v1496_v38 = vsel %vm1425_vm12, %v1411_v41, 0.0  ;;  %v1510_v17 = vsel %vm1425_vm12, %v1413_v7, 0.0 }
 0x48c   :  { %v1485_v19 = vrot.slane %v1484_v27, 2  ;;  %v1492_v29 = vrot.slane %v1491_v37, 2  ;;  %v1497_v54 = vrot.slane %v1496_v38, 4  ;;  %v1511_v62 = vrot.slane %v1510_v17, 4  ;;  %v1339_v61 = vpop.permute.xlu1 %1338  ;;  %v1349_v39 = vpop.permute.xlu0 %1348 }
 0x48d   :  { %v1412_v63 = vmul.f32 %v1339_v61, %v4884_v48  ;;  %v1414_v22 = vmul.f32 %v1349_v39, %v4885_v9  ;;  %v2588_v61 = vld [vmem:[#allocation10 + $0x18] sm:$0xff] }
 0x48e   :  { %v1486_v8 = vadd.f32 %v1485_v19, %v1484_v27  ;;  %v1493_v21 = vadd.f32 %v1492_v29, %v1491_v37  ;;  %v1498_v59 = vadd.f32 %v1497_v54, %v1496_v38  ;;  %v1512_v51 = vadd.f32 %v1511_v62, %v1510_v17  ;;  %v2585_v37 = vld [vmem:[#allocation10] sm:$0xff]  ;;  %v2586_v38 = vld [vmem:[#allocation10 + $0x8] sm:$0xff]  ;;  %v2587_v17 = vld [vmem:[#allocation10 + $0x10] sm:$0xff] }
 0x48f   :  { %v1503_v57 = vsel %vm1425_vm12, %v1412_v63, 0.0  ;;  %v1517_v24 = vsel %vm1425_vm12, %v1414_v22, 0.0  ;;  %v3214_v62 = vpack.c.bf16 %v2586_v38, %v2585_v37 }
 0x490   :  { %v1499_v60 = vrot.slane %v1498_v59, 2  ;;  %v1513_v18 = vrot.slane %v1512_v51, 2  ;;  %v1354_v1 = vpop.permute.xlu0 %1353  ;;  %v1504_v52 = vrot.slane %v1503_v57, 4  ;;  %v1518_v35 = vrot.slane %v1517_v24, 4 }
 0x491   :  { %v1415_v12 = vmul.f32 %v1354_v1, %v4886_v3  ;;  %v1487_v28 = vrot.slane %v1486_v8, 1  ;;  %v1494_v44 = vrot.slane %v1493_v21, 1  ;;  %3215 = vmatpush3.bf16.msra.mxu1 %v3214_v62 }
 0x492   :  { %v1500_v34 = vadd.f32 %v1499_v60, %v1498_v59  ;;  %v1514_v55 = vadd.f32 %v1513_v18, %v1512_v51  ;;  %v1505_v13 = vadd.f32 %v1504_v52, %v1503_v57  ;;  %v1519_v42 = vadd.f32 %v1518_v35, %v1517_v24 }
 0x493   :  { %v1524_v30 = vsel %vm1425_vm12, %v1415_v12, 0.0  ;;  %v1488_v46 = vadd.f32 %v1487_v28, %v1486_v8  ;;  %v1495_v16 = vadd.f32 %v1494_v44, %v1493_v21  ;;  %v3217_v8 = vpack.c.bf16 %v2588_v61, %v2587_v17 }
 0x494   :  { %v1501_v56 = vrot.slane %v1500_v34, 1  ;;  %v1525_v58 = vrot.slane %v1524_v30, 4  ;;  %v1359_v11 = vpop.permute.xlu0 %1358  ;;  %v1506_v53 = vrot.slane %v1505_v13, 2  ;;  %v1520_v36 = vrot.slane %v1519_v42, 2 }
 0x495   :  { %v1416_v20 = vmul.f32 %v1359_v11, %v4887_v45  ;;  %v1515_v14 = vrot.slane %v1514_v55, 1  ;;  %v2505_v21 = vsel %vm1090_vm4, %v1495_v16, %v1488_v46  ;;  %v4888_v57 = vmov 0.0|0.0   ;;  %v4889_v46 = vld [vmem:[#allocation32_spill] sm:$0xff] }
 0x496   :  { %v1526_v5 = vadd.f32 %v1525_v58, %v1524_v30  ;;  %v1507_v41 = vadd.f32 %v1506_v53, %v1505_v13  ;;  %v1521_v7 = vadd.f32 %v1520_v36, %v1519_v42  ;;  %v1502_v19 = vadd.f32 %v1501_v56, %v1500_v34  ;;  %3216 = vmatprep.subr.bf16.mxu1 %v4888_v57 }
 0x497   :  { %v1531_v27 = vsel %vm1425_vm12, %v1416_v20, 0.0  ;;  %v1516_v60 = vadd.f32 %v1515_v14, %v1514_v55  ;;  %3218 = vmatpush3.bf16.msra.mxu1 %v3217_v8  ;;  %v4891_v8 = vld [vmem:[#allocation36_spill] sm:$0xff] }
 0x498   :  { %v1527_v29 = vrot.slane %v1526_v5, 2  ;;  %v1532_v54 = vrot.slane %v1531_v27, 4  ;;  %v1508_v39 = vrot.slane %v1507_v41, 1  ;;  %v1522_v63 = vrot.slane %v1521_v7, 1  ;;  %3219 = vmatprep.subr.bf16.mxu1 %v4888_v57 }
 0x499   :  { %v2506_v24 = vsel %vm1092_vm5, %v1502_v19, %v2505_v21 }
 0x49a   :  { %v1528_v22 = vadd.f32 %v1527_v29, %v1526_v5  ;;  %v1533_v59 = vadd.f32 %v1532_v54, %v1531_v27  ;;  %v1509_v51 = vadd.f32 %v1508_v39, %v1507_v41  ;;  %v1523_v35 = vadd.f32 %v1522_v63, %v1521_v7  ;;  %v4890_v5 = vld [vmem:[#allocation39_spill] sm:$0xff] }
 0x49c   :  { %v1529_v18 = vrot.slane %v1528_v22, 1  ;;  %v1534_v1 = vrot.slane %v1533_v59, 2  ;;  %v2507_v52 = vsel %vm1094_vm6, %v1509_v51, %v2506_v24 }
 0x49d   :  { %v2508_v28 = vsel %vm1096_vm7, %v1516_v60, %v2507_v52  ;;  %v4892_v60 = vld [vmem:[#allocation34_spill] sm:$0xff] }
 0x49e   :  { %v1535_v12 = vadd.f32 %v1534_v1, %v1533_v59  ;;  %v1530_v44 = vadd.f32 %v1529_v18, %v1528_v22  ;;  %v2509_v13 = vsel %vm1098_vm8, %v1523_v35, %v2508_v28 }
 0x4a0   :  { %v1536_v34 = vrot.slane %v1535_v12, 1  ;;  %v2510_v30 = vsel %vm1100_vm9, %v1530_v44, %v2509_v13 }
 0x4a2   :  { %v1537_v42 = vadd.f32 %v1536_v34, %v1535_v12 }
 0x4a4   :  { %v2511_v55 = vsel %vm1102_vm10, %v1537_v42, %v2510_v30 }
 0x4a5   :  { %2521 = vrot.lane.b32.xlu0 %v2511_v55, %s3539_s0 }
 0x4ac   :  { %v1364_v56 = vpop.permute.xlu1 %1363  ;;  %v1369_v58 = vpop.permute.xlu0 %1368 }
 0x4ad   :  { %v1417_v16 = vmul.f32 %v1364_v56, %v4889_v46  ;;  %v1418_v14 = vmul.f32 %v1369_v58, %v4890_v5 }
 0x4af   :  { %v1538_v37 = vsel %vm1425_vm12, %v1417_v16, 0.0  ;;  %v1545_v38 = vsel %vm1425_vm12, %v1418_v14, 0.0 }
 0x4b0   :  { %v1374_v11 = vpop.permute.xlu1 %1373  ;;  %v1384_v53 = vpop.permute.xlu0 %1383  ;;  %v1539_v61 = vrot.slane %v1538_v37, 4  ;;  %v1546_v39 = vrot.slane %v1545_v38, 4 }
 0x4b1   :  { %v1419_v21 = vmul.f32 %v1374_v11, %v4891_v8  ;;  %v1421_v18 = vmul.f32 %v1384_v53, %v4892_v60 }
 0x4b2   :  { %v1547_v1 = vadd.f32 %v1546_v39, %v1545_v38 }
 0x4b3   :  { %v1552_v44 = vsel %vm1425_vm12, %v1419_v21, 0.0  ;;  %v1566_v42 = vsel %vm1425_vm12, %v1421_v18, 0.0 }
 0x4b4   :  { %v1379_v36 = vpop.permute.xlu1 %1378  ;;  %v1389_v20 = vpop.permute.xlu0 %1388  ;;  %v1548_v58 = vrot.slane %v1547_v1, 2  ;;  %v1553_v53 = vrot.slane %v1552_v44, 4 }
 0x4b8   :  { %v2164_v41 = vpop.permute.xlu1 %2163  ;;  %v2194_v7 = vpop.permute.xlu0 %2193 }
 0x4b9   :  { %v2281_v27 = vmul.f32 %v2164_v41, %v3763_v10  ;;  %v2287_v29 = vmul.f32 %v2194_v7, %v4876_v25 }
 0x4bb   :  { %v2306_v62 = vsel %vm2305_vm13, %v2281_v27, 0.0  ;;  %v2348_v24 = vsel %vm2305_vm13, %v2287_v29, 0.0  ;;  %v1567_v27 = vrot.slane %v1566_v42, 4  ;;  %v4894_v29 = vld [vmem:[#allocation40_spill] sm:$0xff] }
 0x4bc   :  { %v2169_v17 = vpop.permute.xlu1 %2168  ;;  %v2199_v19 = vpop.permute.xlu0 %2198  ;;  %v2307_v51 = vrot.slane %v2306_v62, 4  ;;  %v2349_v35 = vrot.slane %v2348_v24, 4 }
 0x4bd   :  { %v2282_v54 = vmul.f32 %v2169_v17, %v4874_v15  ;;  %v2288_v22 = vmul.f32 %v2199_v19, %v4879_v47  ;;  %v1540_v15 = vadd.f32 %v1539_v61, %v1538_v37  ;;  %v4893_v37 = vld [vmem:[#allocation37_spill] sm:$0xff] }
 0x4be   :  { %v2308_v34 = vadd.f32 %v2307_v51, %v2306_v62  ;;  %v2350_v16 = vadd.f32 %v2349_v35, %v2348_v24  ;;  %v1420_v38 = vmul.f32 %v1379_v36, %v4893_v37 }
 0x4bf   :  { %v2313_v63 = vsel %vm2305_vm13, %v2282_v54, 0.0  ;;  %v2355_v52 = vsel %vm2305_vm13, %v2288_v22, 0.0  ;;  %v1422_v54 = vmul.f32 %v1389_v20, %v4894_v29  ;;  %v4590_v20 = vadd.f32 %v1567_v27, %v1566_v42 }
 0x4c0   :  { %v2314_v10 = vrot.slane %v2313_v63, 4  ;;  %v2174_v59 = vpop.permute.xlu1 %2173  ;;  %v2356_v30 = vrot.slane %v2355_v52, 4  ;;  %v2204_v55 = vpop.permute.xlu0 %2203  ;;  %v2309_v17 = vrot.slane %v2308_v34, 2  ;;  %v2351_v21 = vrot.slane %v2350_v16, 2 }
 0x4c1   :  { %v2283_v25 = vmul.f32 %v2174_v59, %v3780_v31  ;;  %v1541_v31 = vrot.slane %v1540_v15, 2  ;;  %v2289_v22 = vmul.f32 %v2204_v55, %v4880_v33  ;;  %v4587_v59 = vadd.f32 %v1553_v53, %v1552_v44 }
 0x4c2   :  { %v2315_v12 = vadd.f32 %v2314_v10, %v2313_v63  ;;  %v2357_v62 = vadd.f32 %v2356_v30, %v2355_v52  ;;  %v4584_v63 = vadd.f32 %v1548_v58, %v1547_v1  ;;  %v2352_v42 = vadd.f32 %v2351_v21, %v2350_v16 }
 0x4c3   :  { %v2320_v28 = vsel %vm2305_vm13, %v2283_v25, 0.0  ;;  %v4582_v39 = vadd.f32 %v1541_v31, %v1540_v15  ;;  %v2310_v25 = vadd.f32 %v2309_v17, %v2308_v34  ;;  %v4593_v15 = vsel %vm1425_vm12, %v1420_v38, 0.0 }
 0x4c4   :  { %v2179_v47 = vpop.permute.xlu1 %2178  ;;  %v2321_v13 = vrot.slane %v2320_v28, 4  ;;  %v2316_v14 = vrot.slane %v2315_v12, 2  ;;  %v2234_v36 = vpop.permute.xlu0 %2233  ;;  %v2358_v1 = vrot.slane %v2357_v62, 2 }
 0x4c5   :  { %v2284_v56 = vmul.f32 %v2179_v47, %v3776_v26  ;;  %v2311_v31 = vrot.slane %v2310_v25, 1  ;;  %v2295_v38 = vmul.f32 %v2234_v36, %v4886_v3 }
 0x4c6   :  { %v2322_v11 = vadd.f32 %v2321_v13, %v2320_v28  ;;  %v2317_v51 = vadd.f32 %v2316_v14, %v2315_v12  ;;  %v4597_v28 = vsel %vm1425_vm12, %v1422_v54, 0.0  ;;  %v2362_v12 = vsel %vm2305_vm13, %v2289_v22, 0.0 }
 0x4c7   :  { %v2327_v41 = vsel %vm2305_vm13, %v2284_v56, 0.0  ;;  %v1555_v13 = vrot.slane %v4587_v59, 2  ;;  %v1560_v56 = vrot.slane %v4593_v15, 4  ;;  %v2363_v14 = vrot.slane %v2362_v12, 4 }
 0x4c8   :  { %v2184_v7 = vpop.permute.xlu1 %2183  ;;  %v2328_v19 = vrot.slane %v2327_v41, 4  ;;  %v2323_v61 = vrot.slane %v2322_v11, 2  ;;  %v2318_v34 = vrot.slane %v2317_v51, 1  ;;  %v2353_v54 = vrot.slane %v2352_v42, 1 }
 0x4c9   :  { %v2285_v26 = vmul.f32 %v2184_v7, %v3806_v50 }
 0x4ca   :  { %v2329_v10 = vadd.f32 %v2328_v19, %v2327_v41  ;;  %v2324_v35 = vadd.f32 %v2323_v61, %v2322_v11  ;;  %v2239_v41 = vpop.permute.xlu0 %2238  ;;  %v1574_v19 = vrot.slane %v4597_v28, 4  ;;  %v2319_v61 = vadd.f32 %v2318_v34, %v2317_v51 }
 0x4cb   :  { %v2334_v24 = vsel %vm2305_vm13, %v2285_v26, 0.0 }
 0x4cc   :  { %v2189_v18 = vpop.permute.xlu1 %2188  ;;  %v2330_v52 = vrot.slane %v2329_v10, 2  ;;  %v2335_v50 = vrot.slane %v2334_v24, 4  ;;  %v2325_v53 = vrot.slane %v2324_v35, 1 }
 0x4cd   :  { %v2286_v33 = vmul.f32 %v2189_v18, %v4875_v49  ;;  %v2359_v49 = vadd.f32 %v2358_v1, %v2357_v62  ;;  %v2296_v62 = vmul.f32 %v2239_v41, %v4887_v45  ;;  %v2312_v18 = vadd.f32 %v2311_v31, %v2310_v25 }
 0x4ce   :  { %v2331_v47 = vadd.f32 %v2330_v52, %v2329_v10  ;;  %v2336_v44 = vadd.f32 %v2335_v50, %v2334_v24  ;;  %v2326_v52 = vadd.f32 %v2325_v53, %v2324_v35  ;;  %v2404_v1 = vsel %vm2305_vm13, %v2295_v38, 0.0 }
 0x4cf   :  { %v2341_v30 = vsel %vm2305_vm13, %v2286_v33, 0.0  ;;  %v2360_v3 = vrot.slane %v2359_v49, 1  ;;  %v2552_v51 = vsel %vm1090_vm4, %v2319_v61, %v2312_v18  ;;  %v2411_v45 = vsel %vm2305_vm13, %v2296_v62, 0.0 }
 0x4d0   :  { %v2209_v55 = vpop.permute.xlu1 %2208  ;;  %v2337_v58 = vrot.slane %v2336_v44, 2  ;;  %v2342_v11 = vrot.slane %v2341_v30, 4  ;;  %v2332_v27 = vrot.slane %v2331_v47, 1  ;;  %v2405_v31 = vrot.slane %v2404_v1, 4 }
 0x4d1   :  { %v2290_v7 = vmul.f32 %v2209_v55, %v4881_v32  ;;  %v2364_v32 = vadd.f32 %v2363_v14, %v2362_v12  ;;  %v2354_v12 = vadd.f32 %v2353_v54, %v2352_v42  ;;  %v2361_v61 = vadd.f32 %v2360_v3, %v2359_v49 }
 0x4d2   :  { %v2338_v17 = vadd.f32 %v2337_v58, %v2336_v44  ;;  %v2343_v16 = vadd.f32 %v2342_v11, %v2341_v30  ;;  %v2333_v36 = vadd.f32 %v2332_v27, %v2331_v47  ;;  %v1543_v54 = vrot.slane %v4582_v39, 1 }
 0x4d3   :  { %v2369_v26 = vsel %vm2305_vm13, %v2290_v7, 0.0  ;;  %v2365_v47 = vrot.slane %v2364_v32, 2  ;;  %v2412_v7 = vrot.slane %v2411_v45, 4 }
 0x4d4   :  { %v2214_v22 = vpop.permute.xlu1 %2213  ;;  %v2339_v10 = vrot.slane %v2338_v17, 1  ;;  %v2344_v21 = vrot.slane %v2343_v16, 2  ;;  %v2370_v24 = vrot.slane %v2369_v26, 4 }
 0x4d5   :  { %v2291_v50 = vmul.f32 %v2214_v22, %v4882_v0  ;;  %v2553_v0 = vsel %vm1092_vm5, %v2326_v52, %v2552_v51  ;;  %v2406_v22 = vadd.f32 %v2405_v31, %v2404_v1  ;;  %v2413_v52 = vadd.f32 %v2412_v7, %v2411_v45 }
 0x4d6   :  { %v2345_v33 = vadd.f32 %v2344_v21, %v2343_v16  ;;  %v2340_v44 = vadd.f32 %v2339_v10, %v2338_v17  ;;  %v2371_v34 = vadd.f32 %v2370_v24, %v2369_v26  ;;  %v2554_v11 = vsel %vm1094_vm6, %v2333_v36, %v2553_v0 }
 0x4d7   :  { %v2376_v30 = vsel %vm2305_vm13, %v2291_v50, 0.0  ;;  %v1556_v21 = vadd.f32 %v1555_v13, %v4587_v59  ;;  %v1561_v24 = vadd.f32 %v1560_v56, %v4593_v15  ;;  %v1575_v1 = vadd.f32 %v1574_v19, %v4597_v28 }
 0x4d8   :  { %v2219_v55 = vpop.permute.xlu1 %2218  ;;  %v2346_v58 = vrot.slane %v2345_v33, 1  ;;  %v2377_v25 = vrot.slane %v2376_v30, 4  ;;  %v2372_v27 = vrot.slane %v2371_v34, 2  ;;  %v2555_v16 = vsel %vm1096_vm7, %v2340_v44, %v2554_v11 }
 0x4d9   :  { %v2292_v35 = vmul.f32 %v2219_v55, %v4884_v48  ;;  %v1550_v59 = vrot.slane %v4584_v63, 1  ;;  %v2407_v15 = vrot.slane %v2406_v22, 2  ;;  %v1562_v55 = vrot.slane %v1561_v24, 2 }
 0x4da   :  { %v2347_v53 = vadd.f32 %v2346_v58, %v2345_v33  ;;  %v2378_v14 = vadd.f32 %v2377_v25, %v2376_v30  ;;  %v2366_v33 = vadd.f32 %v2365_v47, %v2364_v32  ;;  %v4633_v30 = vadd.f32 %v1543_v54, %v4582_v39 }
 0x4db   :  { %v2383_v41 = vsel %vm2305_vm13, %v2292_v35, 0.0  ;;  %v2414_v58 = vrot.slane %v2413_v52, 2  ;;  %v1557_v32 = vrot.slane %v1556_v21, 1  ;;  %v1576_v35 = vrot.slane %v1575_v1, 2 }
 0x4dc   :  { %v2384_v38 = vrot.slane %v2383_v41, 4  ;;  %v2224_v17 = vpop.permute.xlu1 %2223  ;;  %v2379_v26 = vrot.slane %v2378_v14, 2  ;;  %v2556_v42 = vsel %vm1098_vm8, %v2347_v53, %v2555_v16  ;;  %v2408_v0 = vadd.f32 %v2407_v15, %v2406_v22 }
 0x4dd   :  { %v2293_v48 = vmul.f32 %v2224_v17, %v4883_v2  ;;  %v2557_v62 = vsel %vm1100_vm9, %v2354_v12, %v2556_v42  ;;  %v2373_v2 = vadd.f32 %v2372_v27, %v2371_v34  ;;  %v1569_v34 = vrot.slane %v4590_v20, 2 }
 0x4de   :  { %v2385_v10 = vadd.f32 %v2384_v38, %v2383_v41  ;;  %v2558_v49 = vsel %vm1102_vm10, %v2361_v61, %v2557_v62  ;;  %v2380_v51 = vadd.f32 %v2379_v26, %v2378_v14  ;;  %v1551_v14 = vadd.f32 %v1550_v59, %v4584_v63 }
 0x4df   :  { %v2390_v18 = vsel %vm2305_vm13, %v2293_v48, 0.0  ;;  %2573 = vrot.lane.b32.xlu1 %v2558_v49, %s3539_s0  ;;  %v2374_v25 = vrot.slane %v2373_v2, 1  ;;  %v4639_v41 = vadd.f32 %v1569_v34, %v4590_v20  ;;  %v1563_v7 = vadd.f32 %v1562_v55, %v1561_v24 }
 0x4e0   :  { %v2386_v50 = vrot.slane %v2385_v10, 2  ;;  %v2391_v3 = vrot.slane %v2390_v18, 4  ;;  %v2229_v36 = vpop.permute.xlu1 %2228  ;;  %v2381_v12 = vrot.slane %v2380_v51, 1  ;;  %v2415_v38 = vadd.f32 %v2414_v58, %v2413_v52  ;;  %v4895_v52 = vld [vmem:[#allocation38_spill] sm:$0xff] }
 0x4e1   :  { %v2294_v44 = vmul.f32 %v2229_v36, %v4885_v9  ;;  %v2367_v9 = vrot.slane %v2366_v33, 1  ;;  %v2375_v17 = vadd.f32 %v2374_v25, %v2373_v2  ;;  %v1558_v26 = vadd.f32 %v1557_v32, %v1556_v21 }
 0x4e2   :  { %v2387_v13 = vadd.f32 %v2386_v50, %v2385_v10  ;;  %v2392_v56 = vadd.f32 %v2391_v3, %v2390_v18  ;;  %v4642_v48 = vadd.f32 %v1576_v35, %v1575_v1  ;;  %v2382_v42 = vadd.f32 %v2381_v12, %v2380_v51 }
 0x4e3   :  { %v2397_v45 = vsel %vm2305_vm13, %v2294_v44, 0.0  ;;  %v2368_v22 = vadd.f32 %v2367_v9, %v2366_v33  ;;  %v2409_v10 = vrot.slane %v2408_v0, 1  ;;  %v1564_v50 = vrot.slane %v1563_v7, 1 }
 0x4e4   :  { %v2393_v28 = vrot.slane %v2392_v56, 2  ;;  %v2398_v19 = vrot.slane %v2397_v45, 4  ;;  %v2388_v47 = vrot.slane %v2387_v13, 1  ;;  %v2416_v21 = vrot.slane %v2415_v38, 1 }
 0x4e5   :  { %v2559_v3 = vsel %vm1090_vm4, %v2375_v17, %v2368_v22  ;;  %v2410_v44 = vadd.f32 %v2409_v10, %v2408_v0 }
 0x4e6   :  { %v2394_v31 = vadd.f32 %v2393_v28, %v2392_v56  ;;  %v2399_v11 = vadd.f32 %v2398_v19, %v2397_v45  ;;  %v2249_v53 = vpop.permute.xlu1 %2248  ;;  %v2244_v39 = vpop.permute.xlu0 %2243  ;;  %v2389_v62 = vadd.f32 %v2388_v47, %v2387_v13  ;;  %v4896_v45 = vld [vmem:[#allocation41_spill] sm:$0xff]  ;;  %v2417_v28 = vadd.f32 %v2416_v21, %v2415_v38 }
 0x4e7   :  { %v2298_v27 = vmul.f32 %v2249_v53, %v4890_v5  ;;  %v2297_v54 = vmul.f32 %v2244_v39, %v4889_v46  ;;  %v2560_v46 = vsel %vm1092_vm5, %v2382_v42, %v2559_v3  ;;  %v1571_v42 = vrot.slane %v4639_v41, 1 }
 0x4e8   :  { %v2395_v16 = vrot.slane %v2394_v31, 1  ;;  %v2400_v61 = vrot.slane %v2399_v11, 2  ;;  %v2561_v59 = vsel %vm1094_vm6, %v2389_v62, %v2560_v46 }
 0x4e9   :  { %v2425_v24 = vsel %vm2305_vm13, %v2298_v27, 0.0  ;;  %v2418_v1 = vsel %vm2305_vm13, %v2297_v54, 0.0  ;;  %v1578_v54 = vrot.slane %v4642_v48, 1 }
 0x4ea   :  { %v2401_v63 = vadd.f32 %v2400_v61, %v2399_v11  ;;  %v2254_v18 = vpop.permute.xlu1 %2253  ;;  %v1394_v20 = vpop.permute.xlu0 %1393  ;;  %v2396_v49 = vadd.f32 %v2395_v16, %v2394_v31  ;;  %v2419_v19 = vrot.slane %v2418_v1, 4  ;;  %v2512_v31 = vsel %vm1090_vm4, %v1551_v14, %v4633_v30 }
 0x4eb   :  { %v2299_v5 = vmul.f32 %v2254_v18, %v4891_v8  ;;  %v1423_v2 = vmul.f32 %v1394_v20, %v4895_v52  ;;  %v2426_v8 = vrot.slane %v2425_v24, 4  ;;  %v2513_v61 = vsel %vm1092_vm5, %v1558_v26, %v2512_v31 }
 0x4ec   :  { %v2402_v36 = vrot.slane %v2401_v63, 1  ;;  %v2562_v25 = vsel %vm1096_vm7, %v2396_v49, %v2561_v59  ;;  %v2420_v22 = vadd.f32 %v2419_v19, %v2418_v1  ;;  %v1579_v21 = vadd.f32 %v1578_v54, %v4642_v48 }
 0x4ed   :  { %v2432_v33 = vsel %vm2305_vm13, %v2299_v5, 0.0  ;;  %v1580_v51 = vsel %vm1425_vm12, %v1423_v2, 0.0  ;;  %v2427_v11 = vadd.f32 %v2426_v8, %v2425_v24  ;;  %v1572_v5 = vadd.f32 %v1571_v42, %v4639_v41 }
 0x4ee   :  { %v2403_v15 = vadd.f32 %v2402_v36, %v2401_v63  ;;  %v2259_v13 = vpop.permute.xlu1 %2258  ;;  %v1399_v56 = vpop.permute.xlu0 %1398  ;;  %v1581_v34 = vrot.slane %v1580_v51, 4  ;;  %v2433_v32 = vrot.slane %v2432_v33, 4  ;;  %v2421_v2 = vrot.slane %v2420_v22, 2 }
 0x4ef   :  { %v2300_v55 = vmul.f32 %v2259_v13, %v4893_v37  ;;  %v1424_v58 = vmul.f32 %v1399_v56, %v4896_v45  ;;  %v1565_v37 = vadd.f32 %v1564_v50, %v1563_v7  ;;  %v2428_v20 = vrot.slane %v2427_v11, 2 }
 0x4f0   :  { %v2563_v35 = vsel %vm1098_vm8, %v2403_v15, %v2562_v25  ;;  %v1582_v9 = vadd.f32 %v1581_v34, %v1580_v51  ;;  %v2434_v30 = vadd.f32 %v2433_v32, %v2432_v33  ;;  %v2422_v41 = vadd.f32 %v2421_v2, %v2420_v22 }
 0x4f1   :  { %v2439_v12 = vsel %vm2305_vm13, %v2300_v55, 0.0  ;;  %v1587_v0 = vsel %vm1425_vm12, %v1424_v58, 0.0  ;;  %v2564_v47 = vsel %vm1100_vm9, %v2410_v44, %v2563_v35  ;;  %v2514_v62 = vsel %vm1094_vm6, %v1565_v37, %v2513_v61 }
 0x4f2   :  { %v2440_v53 = vrot.slane %v2439_v12, 4  ;;  %v2264_v39 = vpop.permute.xlu1 %2263  ;;  %v1583_v27 = vrot.slane %v1582_v9, 2  ;;  %v1588_v38 = vrot.slane %v1587_v0, 4  ;;  %v2565_v16 = vsel %vm1102_vm10, %v2417_v28, %v2564_v47 }
 0x4f3   :  { %v2301_v17 = vmul.f32 %v2264_v39, %v4892_v60  ;;  %2575 = vrot.lane.b32.xlu1 %v2565_v16, %s3539_s0  ;;  %v2435_v3 = vrot.slane %v2434_v30, 2  ;;  %v2515_v59 = vsel %vm1096_vm7, %v1572_v5, %v2514_v62  ;;  %v2429_v15 = vadd.f32 %v2428_v20, %v2427_v11 }
 0x4f4   :  { %v1584_v14 = vadd.f32 %v1583_v27, %v1582_v9  ;;  %v1589_v7 = vadd.f32 %v1588_v38, %v1587_v0  ;;  %v2441_v63 = vadd.f32 %v2440_v53, %v2439_v12  ;;  %v2516_v58 = vsel %vm1098_vm8, %v1579_v21, %v2515_v59 }
 0x4f5   :  { %v2446_v10 = vsel %vm2305_vm13, %v2301_v17, 0.0  ;;  %v2436_v34 = vadd.f32 %v2435_v3, %v2434_v30  ;;  %v2430_v9 = vrot.slane %v2429_v15, 1  ;;  %v2423_v47 = vrot.slane %v2422_v41, 1  ;;  %v2520_v3 = vpop.permute.xlu0 %2519 }
 0x4f6   :  { %v2447_v60 = vrot.slane %v2446_v10, 4  ;;  %v2269_v18 = vpop.permute.xlu1 %2268  ;;  %v1585_v49 = vrot.slane %v1584_v14, 1  ;;  %v1590_v26 = vrot.slane %v1589_v7, 2  ;;  %v2442_v33 = vrot.slane %v2441_v63, 2 }
 0x4f7   :  { %v2302_v24 = vmul.f32 %v2269_v18, %v4894_v29  ;;  %v2437_v11 = vrot.slane %v2436_v34, 1  ;;  %v2431_v17 = vadd.f32 %v2430_v9, %v2429_v15  ;;  %v2424_v61 = vadd.f32 %v2423_v47, %v2422_v41  ;;  %v4900_v47 = vld [vmem:[#allocation22_spill] sm:$0xff] }
 0x4f8   :  { %v2448_v50 = vadd.f32 %v2447_v60, %v2446_v10  ;;  %v1591_v36 = vadd.f32 %v1590_v26, %v1589_v7  ;;  %v1586_v1 = vadd.f32 %v1585_v49, %v1584_v14  ;;  %v2443_v25 = vadd.f32 %v2442_v33, %v2441_v63 }
 0x4f9   :  { %v2453_v46 = vsel %vm2305_vm13, %v2302_v24, 0.0  ;;  %v2566_v62 = vsel %vm1090_vm4, %v2431_v17, %v2424_v61 }
 0x4fa   :  { %v2454_v51 = vrot.slane %v2453_v46, 4  ;;  %v2274_v44 = vpop.permute.xlu1 %2273  ;;  %v1592_v8 = vrot.slane %v1591_v36, 1  ;;  %v2449_v13 = vrot.slane %v2448_v50, 2  ;;  %v2517_v35 = vsel %vm1100_vm9, %v1586_v1, %v2516_v58  ;;  %v4898_v58 = vld [vmem:[#allocation19_spill] sm:$0xff] }
 0x4fb   :  { %v2303_v29 = vmul.f32 %v2274_v44, %v4895_v52  ;;  %v2444_v39 = vrot.slane %v2443_v25, 1  ;;  %v4897_v1 = vmov 0.0  }
 0x4fc   :  { %v2455_v56 = vadd.f32 %v2454_v51, %v2453_v46  ;;  %v1593_v55 = vadd.f32 %v1592_v8, %v1591_v36  ;;  %v2450_v12 = vadd.f32 %v2449_v13, %v2448_v50 }
 0x4fd   :  { %v2460_v48 = vsel %vm2305_vm13, %v2303_v29, 0.0  ;;  %v2445_v30 = vadd.f32 %v2444_v39, %v2443_v25 }
 0x4fe   :  { %v2456_v28 = vrot.slane %v2455_v56, 2  ;;  %v2461_v19 = vrot.slane %v2460_v48, 4  ;;  %v2279_v32 = vpop.permute.xlu1 %2278  ;;  %v2518_v52 = vsel %vm1102_vm10, %v1593_v55, %v2517_v35  ;;  %v2451_v16 = vrot.slane %v2450_v12, 1  ;;  %v4899_v35 = vld [vmem:[#allocation20_spill] sm:$0xff] }
 0x4ff   :  { %v2304_v0 = vmul.f32 %v2279_v32, %v4896_v45  ;;  %2523 = vrot.lane.b32.xlu0 %v2518_v52, %s3539_s0  ;;  %v2438_v45 = vadd.f32 %v2437_v11, %v2436_v34 }
 0x500   :  { %v2457_v31 = vadd.f32 %v2456_v28, %v2455_v56  ;;  %v2462_v37 = vadd.f32 %v2461_v19, %v2460_v48  ;;  %v2452_v10 = vadd.f32 %v2451_v16, %v2450_v12 }
 0x501   :  { %v2467_v53 = vsel %vm2305_vm13, %v2304_v0, 0.0  ;;  %v2567_v18 = vsel %vm1092_vm5, %v2438_v45, %v2566_v62  ;;  %v2788_v62 = vld [vmem:[#allocation11] sm:$0xff] }
 0x502   :  { %v2463_v27 = vrot.slane %v2462_v37, 2  ;;  %v2468_v38 = vrot.slane %v2467_v53, 4  ;;  %v2458_v42 = vrot.slane %v2457_v31, 1  ;;  %v2568_v49 = vsel %vm1094_vm6, %v2445_v30, %v2567_v18 }
 0x503   :  { %v2569_v24 = vsel %vm1096_vm7, %v2452_v10, %v2568_v49 }
 0x504   :  { %v2464_v54 = vadd.f32 %v2463_v27, %v2462_v37  ;;  %v2469_v22 = vadd.f32 %v2468_v38, %v2467_v53  ;;  %v2459_v63 = vadd.f32 %v2458_v42, %v2457_v31 }
 0x506   :  { %v2465_v14 = vrot.slane %v2464_v54, 1  ;;  %v2470_v7 = vrot.slane %v2469_v22, 2  ;;  %v2570_v2 = vsel %vm1098_vm8, %v2459_v63, %v2569_v24  ;;  %v2789_v63 = vld [vmem:[#allocation11 + $0x8] sm:$0xff] }
 0x507   :  { %v3220_v18 = vpack.c.bf16 %v2789_v63, %v2788_v62 }
 0x508   :  { %v2471_v60 = vadd.f32 %v2470_v7, %v2469_v22  ;;  %v2466_v20 = vadd.f32 %v2465_v14, %v2464_v54  ;;  %v4740_v14 = vld [vmem:[%s4792_s6] sm:$0xff] }
 0x509   :  { %v2780_v7 = vrot.slane %v4740_v14, %v4325_v40  ;;  %v2769_v10 = vrot.slane %v4740_v14, %v4319_v43 }
 0x50a   :  { %v2472_v26 = vrot.slane %v2471_v60, 1  ;;  %v2571_v50 = vsel %vm1100_vm9, %v2466_v20, %v2570_v2  ;;  %v2791_v20 = vld [vmem:[#allocation11 + $0x18] sm:$0xff] }
 0x50c   :  { %v2473_v5 = vadd.f32 %v2472_v26, %v2471_v60  ;;  %v2790_v60 = vld [vmem:[#allocation11 + $0x10] sm:$0xff] }
 0x50d   :  { %v3223_v49 = vpack.c.bf16 %v2791_v20, %v2790_v60 }
 0x50e   :  { %v2572_v21 = vsel %vm1102_vm10, %v2473_v5, %v2571_v50 }
 0x50f   :  { %2577 = vrot.lane.b32.xlu1 %v2572_v21, %s3539_s0 }
 0x517   :  { %v2522_v33 = vpop.permute.xlu0 %2521 }
 0x551   :  { %v2574_v36 = vpop.permute.xlu1 %2573 }
 0x552   :  { %v2582_v46 = vsel %vm799_vm3, %v2520_v3, %v2574_v36 }
 0x553   :  { %3166 = vmatmul.mubr.msk.f32.vlgmr.msra.gmra.mrb[6].mxu1 %vm415_vm2, %v2582_v46 }
 0x554   :  { %3168 = vmatprep.mubr.msk.f32.mxu1 %vm3534_vm0, %v4897_v1  ;;  %3221 = vmatpush3.bf16.msra.mxu1 %v3220_v18 }
 0x555   :  { %3222 = vmatprep.subr.bf16.mxu1 %v4888_v57 }
 0x558   :  { %3224 = vmatpush3.bf16.msra.mxu1 %v3223_v49 }
 0x565   :  { %v2576_v51 = vpop.permute.xlu1 %2575 }
 0x566   :  { %v2583_v44 = vsel %vm799_vm3, %v2522_v33, %v2576_v51 }
 0x567   :  { %3169 = vmatmul.mubr.msk.f32.gmra.mrb[8].mxu1 %vm415_vm2, %v2583_v44 }
 0x568   :  { %3171 = vmatprep.mubr.msk.f32.mxu1 %vm3534_vm0, %v4897_v1 }
 0x571   :  { %v2524_v59 = vpop.permute.xlu0 %2523 }
 0x581   :  { %v2578_v15 = vpop.permute.xlu1 %2577 }
 0x582   :  { %v2584_v8 = vsel %vm799_vm3, %v2524_v59, %v2578_v15 }
 0x583   :  { %3172 = vmatmul.mubr.msk.f32.gmra.mrb[10].mxu1 %vm415_vm2, %v2584_v8 }
 0x584   :  { %3182 = vmatprep.mubr.msk.f32.mxu1 %vm3534_vm0, %v4897_v1 }
 0x626   :  { %v2664_v13 = vpop.f32.mrb[6].mxu1 }
 0x627   :  { %2681 = vrot.lane.b32.xlu0 %v2664_v13, %s3540_s25  ;;  %v3167_v29 = vpop.f32.mrb[7].mxu1 }
 0x63a   :  { %v2669_v41 = vpop.f32.mrb[8].mxu1 }
 0x63b   :  { %2683 = vrot.lane.b32.xlu1 %v2669_v41, %s3540_s25  ;;  %v3170_v56 = vpop.f32.mrb[9].mxu1 }
 0x656   :  { %v2674_v34 = vpop.f32.mrb[10].mxu1 }
 0x657   :  { %2685 = vrot.lane.b32.xlu0 %v2674_v34, %s3540_s25  ;;  %v3173_v55 = vpop.f32.mrb[11].mxu1 }
 0x699   :  { %v2682_v48 = vpop.permute.xlu0 %2681 }
 0x69a   :  { %v2690_v25 = vadd.f32 %v2682_v48, %v4898_v58 }
 0x69c   :  { %v4708_v28 = vmax.f32 %v2690_v25, 0.0 }
 0x69e   :  { %v2721_v19 = vmul.f32 %v4708_v28, %v4708_v28  ;;  %2699 = vrot.lane.b32.xlu1 %v4708_v28, %s3539_s0 }
 0x6a0   :  { %2727 = vrot.lane.b32.xlu0 %v2721_v19, %s3539_s0 }
 0x6ad   :  { %v2684_v32 = vpop.permute.xlu1 %2683 }
 0x6ae   :  { %v2691_v9 = vadd.f32 %v2684_v32, %v4899_v35 }
 0x6b0   :  { %v4716_v12 = vmax.f32 %v2691_v9, 0.0 }
 0x6b2   :  { %v2722_v0 = vmul.f32 %v4716_v12, %v4716_v12  ;;  %2701 = vrot.lane.b32.xlu1 %v4716_v12, %s3539_s0 }
 0x6b4   :  { %2729 = vrot.lane.b32.xlu0 %v2722_v0, %s3539_s0 }
 0x6c9   :  { %v2686_v52 = vpop.permute.xlu0 %2685 }
 0x6ca   :  { %v2692_v31 = vadd.f32 %v2686_v52, %v4900_v47 }
 0x6cc   :  { %v4724_v37 = vmax.f32 %v2692_v31, 0.0 }
 0x6ce   :  { %v2723_v11 = vmul.f32 %v4724_v37, %v4724_v37  ;;  %2703 = vrot.lane.b32.xlu1 %v4724_v37, %s3539_s0 }
 0x6d0   :  { %2731 = vrot.lane.b32.xlu0 %v2723_v11, %s3539_s0 }
 0x710   :  { %v2700_v53 = vpop.permute.xlu1 %2699 }
 0x711   :  { %v2708_v39 = vsel %vm415_vm2, %v2700_v53, 0.0 }
 0x712   :  { %2709 = vadd.xlane.f32.xlu1 %v2708_v39  ;;  %v2728_v27 = vpop.permute.xlu0 %2727 }
 0x713   :  { %v2736_v38 = vsel %vm415_vm2, %v2728_v27, 0.0 }
 0x714   :  { %2737 = vadd.xlane.f32.xlu0 %v2736_v38 }
 0x724   :  { %v2702_v17 = vpop.permute.xlu1 %2701 }
 0x725   :  { %v2711_v16 = vsel %vm415_vm2, %v2702_v17, 0.0 }
 0x726   :  { %2712 = vadd.xlane.f32.xlu0 %v2711_v16  ;;  %v2730_v61 = vpop.permute.xlu0 %2729 }
 0x727   :  { %v2739_v42 = vsel %vm415_vm2, %v2730_v61, 0.0 }
 0x728   :  { %2740 = vadd.xlane.f32.xlu1 %v2739_v42 }
 0x740   :  { %v2704_v54 = vpop.permute.xlu1 %2703 }
 0x741   :  { %v2714_v22 = vsel %vm415_vm2, %v2704_v54, 0.0 }
 0x742   :  { %2715 = vadd.xlane.f32.xlu0 %v2714_v22  ;;  %v2732_v45 = vpop.permute.xlu0 %2731  ;;  %v2916_v22 = vrot.slane %v4740_v14, 6 }
 0x743   :  { %v2742_v30 = vsel %vm415_vm2, %v2732_v45, 0.0 }
 0x744   :  { %2743 = vadd.xlane.f32.xlu1 %v2742_v30  ;;  %3225 = vpush %v2916_v22 }
 0x755   :  { %2782 = vrot.lane.b32.xlu1 %v2780_v7, %s3540_s25 }
 0x758   :  { %2771 = vrot.lane.b32.xlu0 %v2769_v10, %s3540_s25 }
 0x775   :  { %s3226_s6 = spop %3225 }
 0x79f   :  { %v2710_v24 = vpop.xlane.xlu1 %2709 }
 0x7a0   :  { %v2718_v40 = vmul.f32 0.03125, %v2710_v24 }
 0x7a1   :  { %v2738_v26 = vpop.xlane.xlu0 %2737 }
 0x7a2   :  { %v2748_v50 = vmul.f32 %v2718_v40, %v2718_v40  ;;  %v2745_v21 = vmul.f32 0.03125, %v2738_v26  ;;  %v2754_v8 = vsub.f32 %v4708_v28, %v2718_v40  ;;  %v2918_v40 = vstv %s3226_s6 }
 0x7a4   :  { %v2751_v46 = vsub.f32 %v2745_v21, %v2748_v50 }
 0x7a6   :  { %v2757_v51 = vadd.f32 1e-05, %v2751_v46 }
 0x7a8   :  { %3354 = vrsqrt.f32 %v2757_v51 }
 0x7b2   :  { %v3355_v59 = vpop.eup %3354 }
 0x7b3   :  { %v2713_v5 = vpop.xlane.xlu0 %2712  ;;  %v2763_v55 = vmul.f32 %v3355_v59, %v2754_v8 }
 0x7b4   :  { %v2719_v2 = vmul.f32 0.03125, %v2713_v5 }
 0x7b5   :  { %v2741_v43 = vpop.xlane.xlu1 %2740 }
 0x7b6   :  { %v2749_v3 = vmul.f32 %v2719_v2, %v2719_v2  ;;  %v2746_v36 = vmul.f32 0.03125, %v2741_v43  ;;  %v2755_v13 = vsub.f32 %v4716_v12, %v2719_v2 }
 0x7b8   :  { %v2752_v33 = vsub.f32 %v2746_v36, %v2749_v3 }
 0x7ba   :  { %v2758_v44 = vadd.f32 1e-05, %v2752_v33 }
 0x7bc   :  { %3356 = vrsqrt.f32 %v2758_v44 }
 0x7c6   :  { %v3357_v15 = vpop.eup %3356 }
 0x7c7   :  { %v2764_v48 = vmul.f32 %v3357_v15, %v2755_v13 }
 0x7cf   :  { %v2716_v57 = vpop.xlane.xlu0 %2715 }
 0x7d0   :  { %v2720_v29 = vmul.f32 0.03125, %v2716_v57 }
 0x7d1   :  { %v2744_v41 = vpop.xlane.xlu1 %2743 }
 0x7d2   :  { %v2750_v56 = vmul.f32 %v2720_v29, %v2720_v29  ;;  %v2747_v34 = vmul.f32 0.03125, %v2744_v41  ;;  %v2756_v28 = vsub.f32 %v4724_v37, %v2720_v29  ;;  %v2795_v37 = vrot.slane %v4740_v14, %v4331_v23 }
 0x7d3   :  { %v2772_v58 = vpop.permute.xlu0 %2771  ;;  %v2906_v23 = vrot.slane %v4740_v14, %v4381_v4 }
 0x7d4   :  { %v2753_v25 = vsub.f32 %v2747_v34, %v2750_v56  ;;  %v2774_v19 = vmul.f32 %v2772_v58, %v2763_v55  ;;  %v2775_v32 = vmul.f32 %v2772_v58, %v2764_v48 }
 0x7d5   :  { %v2783_v35 = vpop.permute.xlu1 %2782 }
 0x7d6   :  { %v2759_v9 = vadd.f32 1e-05, %v2753_v25  ;;  %v2785_v0 = vadd.f32 %v2783_v35, %v2774_v19  ;;  %v2786_v52 = vadd.f32 %v2783_v35, %v2775_v32 }
 0x7d8   :  { %3358 = vrsqrt.f32 %v2759_v9  ;;  %2801 = vrot.lane.b32.xlu0 %v2786_v52, %s3539_s0  ;;  %2799 = vrot.lane.b32.xlu1 %v2785_v0, %s3539_s0 }
 0x7e2   :  { %v3359_v12 = vpop.eup %3358 }
 0x7e3   :  { %v2765_v47 = vmul.f32 %v3359_v12, %v2756_v28 }
 0x7e5   :  { %v2776_v31 = vmul.f32 %v2772_v58, %v2765_v47 }
 0x7e7   :  { %v2787_v11 = vadd.f32 %v2783_v35, %v2776_v31 }
 0x7e9   :  { %2803 = vrot.lane.b32.xlu1 %v2787_v11, %s3539_s0 }
 0x84a   :  { %v2800_v53 = vpop.permute.xlu1 %2799  ;;  %v2802_v39 = vpop.permute.xlu0 %2801 }
 0x84b   :  { %3183 = vmatmul.mubr.msk.f32.vlgmr.msra.gmra.mrb[12].mxu1 %vm415_vm2, %v2800_v53 }
 0x84c   :  { %3185 = vmatprep.mubr.msk.f32.mxu1 %vm3534_vm0, %v4897_v1 }
 0x84f   :  { %3186 = vmatmul.mubr.msk.f32.gmra.mrb[14].mxu1 %vm415_vm2, %v2802_v39 }
 0x850   :  { %3188 = vmatprep.mubr.msk.f32.mxu1 %vm3534_vm0, %v4897_v1 }
 0x85b   :  { %v2804_v27 = vpop.permute.xlu1 %2803 }
 0x85c   :  { %3189 = vmatmul.mubr.msk.f32.gmra.mrb[16].mxu1 %vm415_vm2, %v2804_v27 }
 0x91e   :  { %v2877_v38 = vpop.f32.mrb[12].mxu1 }
 0x91f   :  { %v2878_v17 = vadd.f32 %v2877_v38, %v2795_v37  ;;  %v3184_v16 = vpop.f32.mrb[13].mxu1 }
 0x922   :  { %v2882_v61 = vpop.f32.mrb[14].mxu1 }
 0x923   :  { %v2883_v42 = vadd.f32 %v2882_v61, %v2795_v37  ;;  %v3187_v54 = vpop.f32.mrb[15].mxu1 }
 0x925   :  { %2893 = vrot.lane.b32.xlu0 %v2883_v42, %s3539_s0 }
 0x92f   :  { %v2887_v45 = vpop.f32.mrb[16].mxu1 }
 0x930   :  { %v2888_v30 = vadd.f32 %v2887_v45, %v2795_v37  ;;  %v3190_v1 = vpop.f32.mrb[17].mxu1 }
 0x932   :  { %2895 = vrot.lane.b32.xlu1 %v2888_v30, %s3539_s0 }
 0x997   :  { %v2894_v7 = vpop.permute.xlu0 %2893 }
 0x998   :  { %v2899_v10 = vadd.f32 %v2894_v7, %v2878_v17 }
 0x99a   :  { %v2901_v62 = vmax.f32 %v2899_v10, 0.0 }
 0x99c   :  { %v2907_v63 = vmul.f32 %v2906_v23, %v2901_v62 }
 0x99e   :  { %v2909_v60 = vsel %vm415_vm2, %v2907_v63, 0.0 }
 0x99f   :  { %2910 = vadd.xlane.f32.xlu0 %v2909_v60 }
 0x9a4   :  { %v2896_v18 = vpop.permute.xlu1 %2895 }
 0x9a5   :  { %v2900_v20 = vadd.f32 %v2896_v18, %v2878_v17 }
 0x9a7   :  { %v2902_v49 = vmax.f32 %v2900_v20, 0.0 }
 0x9a9   :  { %v2908_v26 = vmul.f32 %v2906_v23, %v2902_v49 }
 0x9ab   :  { %v2912_v24 = vsel %vm415_vm2, %v2908_v26, 0.0 }
 0x9ac   :  { %2913 = vadd.xlane.f32.xlu1 %v2912_v24 }
 0xa2c   :  { %v2911_v5 = vpop.xlane.xlu0 %2910 }
 0xa2d   :  { %v2920_v2 = vadd.f32 %v2918_v40, %v2911_v5 }
 0xa2f   :  { %v2927_v4 = vrot.slane %v2920_v2, %v4067_v6 }
 0xa39   :  { %v2914_v43 = vpop.xlane.xlu1 %2913 }
 0xa3a   :  { %v2921_v50 = vadd.f32 %v2918_v40, %v2914_v43 }
 0xa3c   :  { %v2931_v14 = vrot.slane %v2921_v50, %v4067_v6 }
 0xa3e   :  { %v2932_v21 = vsel %vm1090_vm4, %v2931_v14, %v2927_v4 }
 0xa3f   :  { %2935 = vst.msk [vmem:[#allocation13] sm:$0x3] %vm2934_vm14, %v2932_v21 }
 0xa40   :  { %3504 = shalt.err (!%p3501_p10)
}
 0xa41   :  { %s3505_s12 = scalar_lea.hbm %s4793_s7, 32 }
 0xa42   :  { %p3506_p11 = scmp.ne.s32.totalorder %s4793_s7, %s3505_s12  ;;  %p3509_p12 = scmp.lt.u32.totalorder %s3505_s12, %s4793_s7 }
 0xa44   :  { %p3511_p13 = pnand %p3509_p12, %p3506_p11 }
 0xa46   :  { %3514 = shalt.err (!%p3511_p13)
}
 0xa47   :  { %2945 = dma.vmem_to_hbm [thread:$0]  %s2943_s8, 32, %s4793_s7, [#allocation4]  }
 0xa48   :  { %3523 = dma.done.wait [#allocation4], 32  }
 0xa49   :  { %3524 = vsyncadd [#allocation4], 4294967264 }
 0xa4a   :  { %2949 = vsyncpa [#allocation3], 1 }
 0xa4b   :  { %2950 = vsyncpa [#allocation6], 1 }
 0xa4c   :  { %2951 = vsyncpa [#allocation9], 1 }
 0xa4d   :  { %2952 = vsyncpa [#allocation12], 1 }
 0xa4e   :  { %2953 = vsyncpa [#allocation4], 1 }

</bundles_post_ra>
